<compile_context>
chip_gen: v5e
topology: v5e:2x2
jax: 0.10.0
libtpu: 0.0.40
codegen_flags: <defaults>
</compile_context>

<pallas_src>
import jax
import jax.numpy as jnp
from jax import lax
from jax.experimental import pallas as pl
from jax.experimental.pallas import tpu as pltpu

BN_EPS = 1e-5            # torch.nn.BatchNorm1d default eps
L1_NORM_EPS = 1e-12      # torch.nn.functional.normalize default eps
_HIGHEST = jax.lax.Precision.HIGHEST


def _make_kernel(M, D, LD, G, K, GS):
    """Builds the per-batch-element NeXtVLAD kernel (all sizes static)."""

    def kernel(x_ref, w0_ref, b0_ref, wgk_ref, bgk_ref, wg_ref, bg_ref,
               bn0s_ref, bn0t_ref, cw2_ref, bn1s_ref, bn1t_ref, out_ref):
        # Input for this batch element, feature-major: (D, M)
        x = x_ref[0].astype(jnp.float32)

        # fc0 in transposed space: x_dot^T = W0 @ x + b0   -> (LD, M)
        xdt = jnp.dot(w0_ref[...], x, preferred_element_type=jnp.float32,
                      precision=_HIGHEST) + b0_ref[...]

        # fc_gk for ALL groups in one MXU contraction (+ bias + bn0 affine):
        #   WgkX^T = Wgk @ x_dot^T + bgk                    -> (G*K, M)
        wgkx = jnp.dot(wgk_ref[...], xdt, preferred_element_type=jnp.float32,
                       precision=_HIGHEST) + bgk_ref[...]
        wgkx = wgkx * bn0s_ref[...] + bn0t_ref[...]

        # group gates for ALL groups in one contraction:
        #   sigmoid(fc_g(x_dot))^T                          -> (G, M)
        lg = jnp.dot(wg_ref[...], xdt, preferred_element_type=jnp.float32,
                     precision=_HIGHEST) + bg_ref[...]
        gates = 1.0 / (1.0 + jnp.exp(-lg))

        ones_row = jnp.ones((1, M), jnp.float32)
        a_sum = jnp.zeros((1, K), jnp.float32)     # sum of activations over (m, g)
        vlad = jnp.zeros((GS, K), jnp.float32)     # (group_size, K) accumulator

        for g in range(G):            # G is small (4); unrolled at trace time
            sg = wgkx[g * K:(g + 1) * K, :]                     # (K, M)

            # softmax over the K clusters (axis 0 in transposed space)
            mx = jnp.max(sg, axis=0, keepdims=True)
            e = jnp.exp(sg - mx)
            alpha_gk = e / jnp.sum(e, axis=0, keepdims=True)    # (K, M)

            act = alpha_gk * gates[g:g + 1, :]                  # (K, M)

            # a_sum += sum_m act, produced directly as a (1, K) row on the MXU
            a_sum = a_sum + lax.dot_general(
                ones_row, act, (((1,), (1,)), ((), ())),
                preferred_element_type=jnp.float32, precision=_HIGHEST)

            # x_tilde^T for group g is a row-block of x_dot^T:  (GS, M)
            xt = xdt[g * GS:(g + 1) * GS, :]

            # vlad += x_tilde_g^T (NT) activation_g             -> (GS, K)
            vlad = vlad + lax.dot_general(
                xt, act, (((1,), (1,)), ((), ())),
                preferred_element_type=jnp.float32, precision=_HIGHEST)

        a = a_sum * cw2_ref[...]                                # (GS, K)
        v = vlad - a

        # F.normalize(vlad, p=1, dim=group_size axis)
        denom = jnp.maximum(jnp.sum(jnp.abs(v), axis=0, keepdims=True),
                            L1_NORM_EPS)
        v = v / denom

        # bn1 (eval mode): scalar affine
        v = v * bn1s_ref[...] + bn1t_ref[...]

        out_ref[0] = v.astype(out_ref.dtype)

    return kernel


def nextvlad_forward(x, params, *, num_clusters, groups, lamb):
    """x: (B, dim, M, T) float32, PyTorch NeXtVLAD input layout.
    Returns (B, num_clusters * group_size) == NeXtVLAD.forward(x) in eval mode."""
    B, D, M, _ = x.shape
    K = num_clusters
    G = groups
    LD = lamb * D
    GS = LD // G
    f32 = jnp.float32

    # PyTorch does x[:, :, :, 0].permute(0, 2, 1).  We only do the (cheap)
    # [..., 0] slice and keep the feature-major (B, D, M) layout; the kernel
    # contracts over D directly, avoiding a full HBM transpose pass.
    x_dm = x[:, :, :, 0].astype(f32)

    # Parameters in their native PyTorch layouts (no transposes needed).
    w0 = params["fc0_w"].astype(f32)                      # (LD, D)
    b0 = params["fc0_b"].astype(f32)[:, None]             # (LD, 1)
    wgk = params["fc_gk_w"].astype(f32)                   # (G*K, LD)
    bgk = params["fc_gk_b"].astype(f32)[:, None]          # (G*K, 1)
    wg = params["fc_g_w"].astype(f32)                     # (G, LD)
    bg = params["fc_g_b"].astype(f32)[:, None]            # (G, 1)
    cw2 = params["cluster_weights2"].astype(f32)[0]       # (GS, K)

    # Fold BatchNorm (eval mode) into per-channel scale/shift.
    s0 = params["bn0_weight"] / jnp.sqrt(params["bn0_var"] + BN_EPS)
    t0 = params["bn0_bias"] - params["bn0_mean"] * s0
    bn0_s = s0.astype(f32)[None, :]                        # (1, M)
    bn0_t = t0.astype(f32)[None, :]                        # (1, M)
    s1 = params["bn1_weight"] / jnp.sqrt(params["bn1_var"] + BN_EPS)
    t1 = params["bn1_bias"] - params["bn1_mean"] * s1
    bn1_s = jnp.reshape(s1.astype(f32), (1, 1))
    bn1_t = jnp.reshape(t1.astype(f32), (1, 1))

    kernel = _make_kernel(M, D, LD, G, K, GS)
    const2 = lambda *_: (0, 0)

    out = pl.pallas_call(
        kernel,
        out_shape=jax.ShapeDtypeStruct((B, GS, K), f32),
        grid_spec=pltpu.PrefetchScalarGridSpec(
            num_scalar_prefetch=0,
            grid=(B,),     # one sample per step; per-step work is matmul-heavy,
                           # and "parallel" lets v7x shard the batch across TCs
            in_specs=[
                pl.BlockSpec((1, D, M), lambda b: (b, 0, 0)),   # x (feature-major)
                pl.BlockSpec((LD, D), const2),                  # fc0 weight
                pl.BlockSpec((LD, 1), const2),                  # fc0 bias
                pl.BlockSpec((G * K, LD), const2),              # fc_gk weight
                pl.BlockSpec((G * K, 1), const2),               # fc_gk bias
                pl.BlockSpec((G, LD), const2),                  # fc_g weight
                pl.BlockSpec((G, 1), const2),                   # fc_g bias
                pl.BlockSpec((1, M), const2),                   # bn0 scale
                pl.BlockSpec((1, M), const2),                   # bn0 shift
                pl.BlockSpec((GS, K), const2),                  # cluster_weights2
                pl.BlockSpec((1, 1), const2),                   # bn1 scale
                pl.BlockSpec((1, 1), const2),                   # bn1 shift
            ],
            out_specs=pl.BlockSpec((1, GS, K), lambda b: (b, 0, 0)),
        ),
        compiler_params=pltpu.CompilerParams(
            dimension_semantics=("parallel",)),
    )(x_dm, w0, b0, wgk, bgk, wg, bg, bn0_s, bn0_t, cw2, bn1_s, bn1_t)

    # (B, GS, K) -> (B, K*GS): row-major flatten, identical element order to the
    # PyTorch vlad.reshape(-1, K * group_size) (its data is also (B, GS, K)).
    return out.reshape(B, GS * K)


def _reference(x, params, *, num_clusters, groups, lamb):
    """Pure-JAX mirror of NeXtVLAD.forward (eval-mode BN) for a sanity check."""
    B, D, M, _ = x.shape
    K, G = num_clusters, groups
    LD = lamb * D
    GS = LD // G
    hp = jax.lax.Precision.HIGHEST

    xp = jnp.transpose(x[:, :, :, 0].astype(jnp.float32), (0, 2, 1))   # (B, M, D)
    x_dot = jnp.matmul(xp, params["fc0_w"].T, precision=hp) + params["fc0_b"]
    x_tilde = x_dot.reshape(B, M, G, GS)
    wgkx = jnp.matmul(x_dot, params["fc_gk_w"].T, precision=hp) + params["fc_gk_b"]
    s0 = params["bn0_weight"] / jnp.sqrt(params["bn0_var"] + BN_EPS)
    t0 = params["bn0_bias"] - params["bn0_mean"] * s0
    wgkx = wgkx * s0[None, :, None] + t0[None, :, None]
    alpha_gk = jax.nn.softmax(wgkx.reshape(B, M * G, K), axis=-1)
    alpha_g = jax.nn.sigmoid(
        jnp.matmul(x_dot, params["fc_g_w"].T, precision=hp) + params["fc_g_b"])
    alpha_g = alpha_g.reshape(B, M * G, 1)
    activation = alpha_gk * alpha_g
    a_sum = jnp.sum(activation, axis=-2, keepdims=True)                # (B, 1, K)
    a = a_sum * params["cluster_weights2"]                             # (B, GS, K)
    vlad = jnp.matmul(jnp.transpose(activation, (0, 2, 1)),
                      x_tilde.reshape(B, M * G, GS), precision=hp)     # (B, K, GS)
    vlad = jnp.transpose(vlad, (0, 2, 1)) - a                          # (B, GS, K)
    denom = jnp.maximum(jnp.sum(jnp.abs(vlad), axis=1, keepdims=True),
                        L1_NORM_EPS)
    vlad = vlad / denom
    s1 = params["bn1_weight"] / jnp.sqrt(params["bn1_var"] + BN_EPS)
    t1 = params["bn1_bias"] - params["bn1_mean"] * s1
    vlad = vlad * s1 + t1
    return vlad.reshape(B, K * GS)


if __name__ == "__main__":
    # Small shapes consistent with the module: dim=32, M=16 frames, T=1,
    # num_clusters=16, groups=4, lamb=2  ->  group_size=16, output dim = 256.
    B, D, M, T = 2, 32, 16, 1
    K, G, LAMB = 16, 4, 2
    LD = LAMB * D
    GS = LD // G

    keys = jax.random.split(jax.random.PRNGKey(0), 16)
    x = jax.random.normal(keys[0], (B, D, M, T), dtype=jnp.float32)
    params = {
        "fc0_w": 0.1 * jax.random.normal(keys[1], (LD, D), jnp.float32),
        "fc0_b": 0.1 * jax.random.normal(keys[2], (LD,), jnp.float32),
        "fc_gk_w": 0.1 * jax.random.normal(keys[3], (G * K, LD), jnp.float32),
        "fc_gk_b": 0.1 * jax.random.normal(keys[4], (G * K,), jnp.float32),
        "fc_g_w": 0.1 * jax.random.normal(keys[5], (G, LD), jnp.float32),
        "fc_g_b": 0.1 * jax.random.normal(keys[6], (G,), jnp.float32),
        "cluster_weights2": jax.random.uniform(keys[7], (1, GS, K), jnp.float32),
        # BatchNorm (eval mode): weight, bias, running stats.
        "bn0_weight": 1.0 + 0.1 * jax.random.normal(keys[8], (M,), jnp.float32),
        "bn0_bias": 0.1 * jax.random.normal(keys[9], (M,), jnp.float32),
        "bn0_mean": 0.1 * jax.random.normal(keys[10], (M,), jnp.float32),
        "bn0_var": 1.0 + 0.2 * jax.random.uniform(keys[11], (M,), jnp.float32),
        "bn1_weight": 1.0 + 0.1 * jax.random.normal(keys[12], (), jnp.float32),
        "bn1_bias": 0.1 * jax.random.normal(keys[13], (), jnp.float32),
        "bn1_mean": 0.1 * jax.random.normal(keys[14], (), jnp.float32),
        "bn1_var": 1.0 + 0.2 * jax.random.uniform(keys[15], (), jnp.float32),
    }

    out = nextvlad_forward(x, params, num_clusters=K, groups=G, lamb=LAMB)
    out = jax.block_until_ready(out)

    ref = _reference(x, params, num_clusters=K, groups=G, lamb=LAMB)
    assert out.shape == (B, K * GS), out.shape
    assert jnp.allclose(out, ref, atol=2e-5, rtol=1e-3), (
        "mismatch vs reference; max abs diff = %g"
        % float(jnp.max(jnp.abs(out - ref))))
    print("KERNEL_OK")
</pallas_src>

<mosaic_0001>
module attributes {stable_mosaic.version = 11 : i64} {
  func.func @kernel(%arg0: i32, %arg1: memref<1x32x16xf32, #tpu.memory_space<vmem>>, %arg2: memref<64x32xf32, #tpu.memory_space<vmem>>, %arg3: memref<64x1xf32, #tpu.memory_space<vmem>>, %arg4: memref<64x64xf32, #tpu.memory_space<vmem>>, %arg5: memref<64x1xf32, #tpu.memory_space<vmem>>, %arg6: memref<4x64xf32, #tpu.memory_space<vmem>>, %arg7: memref<4x1xf32, #tpu.memory_space<vmem>>, %arg8: memref<1x16xf32, #tpu.memory_space<vmem>>, %arg9: memref<1x16xf32, #tpu.memory_space<vmem>>, %arg10: memref<16x16xf32, #tpu.memory_space<vmem>>, %arg11: memref<1x1xf32, #tpu.memory_space<vmem>>, %arg12: memref<1x1xf32, #tpu.memory_space<vmem>>, %arg13: memref<1x16x16xf32, #tpu.memory_space<vmem>>) attributes {dimension_semantics = [#tpu.dimension_semantics<parallel>], iteration_bounds = array<i64: 2>, scalar_prefetch = 0 : i64, scratch_operands = 0 : i64, tpu.core_type = #tpu.core_type<tc>, window_params = [{transform_indices = @transform_0, window_bounds = array<i64: 1, 32, 16>}, {pipeline_mode = #tpu.pipeline_mode<synchronous>, transform_indices = @transform_1, window_bounds = array<i64: 64, 32>}, {pipeline_mode = #tpu.pipeline_mode<synchronous>, transform_indices = @transform_2, window_bounds = array<i64: 64, 1>}, {pipeline_mode = #tpu.pipeline_mode<synchronous>, transform_indices = @transform_3, window_bounds = array<i64: 64, 64>}, {pipeline_mode = #tpu.pipeline_mode<synchronous>, transform_indices = @transform_4, window_bounds = array<i64: 64, 1>}, {pipeline_mode = #tpu.pipeline_mode<synchronous>, transform_indices = @transform_5, window_bounds = array<i64: 4, 64>}, {pipeline_mode = #tpu.pipeline_mode<synchronous>, transform_indices = @transform_6, window_bounds = array<i64: 4, 1>}, {pipeline_mode = #tpu.pipeline_mode<synchronous>, transform_indices = @transform_7, window_bounds = array<i64: 1, 16>}, {pipeline_mode = #tpu.pipeline_mode<synchronous>, transform_indices = @transform_8, window_bounds = array<i64: 1, 16>}, {pipeline_mode = #tpu.pipeline_mode<synchronous>, transform_indices = @transform_9, window_bounds = array<i64: 16, 16>}, {pipeline_mode = #tpu.pipeline_mode<synchronous>, transform_indices = @transform_10, window_bounds = array<i64: 1, 1>}, {pipeline_mode = #tpu.pipeline_mode<synchronous>, transform_indices = @transform_11, window_bounds = array<i64: 1, 1>}, {transform_indices = @transform_12, window_bounds = array<i64: 1, 16, 16>}]} {
    %c0 = arith.constant 0 : index
    %c0_0 = arith.constant 0 : index
    %c0_1 = arith.constant 0 : index
    %0 = vector.load %arg1[%c0, %c0_0, %c0_1] : memref<1x32x16xf32, #tpu.memory_space<vmem>>, vector<1x32x16xf32>
    %1 = vector.shape_cast %0 : vector<1x32x16xf32> to vector<32x16xf32>
    %c0_2 = arith.constant 0 : index
    %c0_3 = arith.constant 0 : index
    %2 = vector.load %arg2[%c0_2, %c0_3] : memref<64x32xf32, #tpu.memory_space<vmem>>, vector<64x32xf32>
    %cst = arith.constant dense<0.000000e+00> : vector<64x16xf32>
    %3 = tpu.matmul %2, %1, %cst {dimension_numbers = #tpu.dot_dimension_numbers<[1], [0], [0], [1], [0, 0, 1, 1], [], []>, precision = #tpu.contract_precision<fp32>} : vector<64x32xf32>, vector<32x16xf32>, vector<64x16xf32> -> vector<64x16xf32>
    %c0_4 = arith.constant 0 : index
    %c0_5 = arith.constant 0 : index
    %4 = vector.load %arg3[%c0_4, %c0_5] : memref<64x1xf32, #tpu.memory_space<vmem>>, vector<64x1xf32>
    %5 = vector.broadcast %4 : vector<64x1xf32> to vector<64x16xf32>
    %6 = arith.addf %3, %5 : vector<64x16xf32>
    %c0_6 = arith.constant 0 : index
    %c0_7 = arith.constant 0 : index
    %7 = vector.load %arg4[%c0_6, %c0_7] : memref<64x64xf32, #tpu.memory_space<vmem>>, vector<64x64xf32>
    %cst_8 = arith.constant dense<0.000000e+00> : vector<64x16xf32>
    %8 = tpu.matmul %7, %6, %cst_8 {dimension_numbers = #tpu.dot_dimension_numbers<[1], [0], [0], [1], [0, 0, 1, 1], [], []>, precision = #tpu.contract_precision<fp32>} : vector<64x64xf32>, vector<64x16xf32>, vector<64x16xf32> -> vector<64x16xf32>
    %c0_9 = arith.constant 0 : index
    %c0_10 = arith.constant 0 : index
    %9 = vector.load %arg5[%c0_9, %c0_10] : memref<64x1xf32, #tpu.memory_space<vmem>>, vector<64x1xf32>
    %10 = vector.broadcast %9 : vector<64x1xf32> to vector<64x16xf32>
    %11 = arith.addf %8, %10 : vector<64x16xf32>
    %c0_11 = arith.constant 0 : index
    %c0_12 = arith.constant 0 : index
    %12 = vector.load %arg8[%c0_11, %c0_12] : memref<1x16xf32, #tpu.memory_space<vmem>>, vector<1x16xf32>
    %13 = vector.broadcast %12 : vector<1x16xf32> to vector<64x16xf32>
    %14 = arith.mulf %11, %13 : vector<64x16xf32>
    %c0_13 = arith.constant 0 : index
    %c0_14 = arith.constant 0 : index
    %15 = vector.load %arg9[%c0_13, %c0_14] : memref<1x16xf32, #tpu.memory_space<vmem>>, vector<1x16xf32>
    %16 = vector.broadcast %15 : vector<1x16xf32> to vector<64x16xf32>
    %17 = arith.addf %14, %16 : vector<64x16xf32>
    %c0_15 = arith.constant 0 : index
    %c0_16 = arith.constant 0 : index
    %18 = vector.load %arg6[%c0_15, %c0_16] : memref<4x64xf32, #tpu.memory_space<vmem>>, vector<4x64xf32>
    %cst_17 = arith.constant dense<0.000000e+00> : vector<4x16xf32>
    %19 = tpu.matmul %18, %6, %cst_17 {dimension_numbers = #tpu.dot_dimension_numbers<[1], [0], [0], [1], [0, 0, 1, 1], [], []>, precision = #tpu.contract_precision<fp32>} : vector<4x64xf32>, vector<64x16xf32>, vector<4x16xf32> -> vector<4x16xf32>
    %c0_18 = arith.constant 0 : index
    %c0_19 = arith.constant 0 : index
    %20 = vector.load %arg7[%c0_18, %c0_19] : memref<4x1xf32, #tpu.memory_space<vmem>>, vector<4x1xf32>
    %21 = vector.broadcast %20 : vector<4x1xf32> to vector<4x16xf32>
    %22 = arith.addf %19, %21 : vector<4x16xf32>
    %cst_20 = arith.constant 0.000000e+00 : f32
    %23 = vector.broadcast %cst_20 : f32 to vector<4x16xf32>
    %24 = arith.subf %23, %22 : vector<4x16xf32>
    %25 = math.exp %24 : vector<4x16xf32>
    %cst_21 = arith.constant 1.000000e+00 : f32
    %26 = vector.broadcast %cst_21 : f32 to vector<4x16xf32>
    %27 = arith.addf %26, %25 : vector<4x16xf32>
    %cst_22 = arith.constant 1.000000e+00 : f32
    %28 = vector.broadcast %cst_22 : f32 to vector<4x16xf32>
    %29 = arith.divf %28, %27 : vector<4x16xf32>
    %cst_23 = arith.constant 1.000000e+00 : f32
    %30 = vector.broadcast %cst_23 : f32 to vector<1x16xf32>
    %cst_24 = arith.constant 0.000000e+00 : f32
    %31 = vector.broadcast %cst_24 : f32 to vector<1x16xf32>
    %cst_25 = arith.constant 0.000000e+00 : f32
    %32 = vector.broadcast %cst_25 : f32 to vector<16x16xf32>
    %33 = vector.extract_strided_slice %17 {offsets = [0, 0], sizes = [16, 16], strides = [1, 1]} : vector<64x16xf32> to vector<16x16xf32>
    %cst_26 = arith.constant dense<0xFF800000> : vector<16xf32>
    %34 = vector.multi_reduction <maximumf>, %33, %cst_26 [0] : vector<16x16xf32> to vector<16xf32>
    %35 = vector.shape_cast %34 : vector<16xf32> to vector<1x16xf32>
    %36 = vector.broadcast %35 : vector<1x16xf32> to vector<16x16xf32>
    %37 = arith.subf %33, %36 : vector<16x16xf32>
    %38 = math.exp %37 : vector<16x16xf32>
    %cst_27 = arith.constant dense<0.000000e+00> : vector<16xf32>
    %39 = vector.multi_reduction <add>, %38, %cst_27 [0] : vector<16x16xf32> to vector<16xf32>
    %40 = vector.shape_cast %39 : vector<16xf32> to vector<1x16xf32>
    %41 = vector.broadcast %40 : vector<1x16xf32> to vector<16x16xf32>
    %42 = arith.divf %38, %41 : vector<16x16xf32>
    %43 = vector.extract_strided_slice %29 {offsets = [0, 0], sizes = [1, 16], strides = [1, 1]} : vector<4x16xf32> to vector<1x16xf32>
    %44 = vector.broadcast %43 : vector<1x16xf32> to vector<16x16xf32>
    %45 = arith.mulf %42, %44 : vector<16x16xf32>
    %cst_28 = arith.constant dense<0.000000e+00> : vector<1x16xf32>
    %46 = tpu.matmul %30, %45, %cst_28 {dimension_numbers = #tpu.dot_dimension_numbers<[1], [1], [0], [0], [0, 0, 1, 0], [], []>, precision = #tpu.contract_precision<fp32>} : vector<1x16xf32>, vector<16x16xf32>, vector<1x16xf32> -> vector<1x16xf32>
    %47 = arith.addf %31, %46 : vector<1x16xf32>
    %48 = vector.extract_strided_slice %6 {offsets = [0, 0], sizes = [16, 16], strides = [1, 1]} : vector<64x16xf32> to vector<16x16xf32>
    %cst_29 = arith.constant dense<0.000000e+00> : vector<16x16xf32>
    %49 = tpu.matmul %48, %45, %cst_29 {dimension_numbers = #tpu.dot_dimension_numbers<[1], [1], [0], [0], [0, 0, 1, 0], [], []>, precision = #tpu.contract_precision<fp32>} : vector<16x16xf32>, vector<16x16xf32>, vector<16x16xf32> -> vector<16x16xf32>
    %50 = arith.addf %32, %49 : vector<16x16xf32>
    %51 = vector.extract_strided_slice %17 {offsets = [16, 0], sizes = [16, 16], strides = [1, 1]} : vector<64x16xf32> to vector<16x16xf32>
    %cst_30 = arith.constant dense<0xFF800000> : vector<16xf32>
    %52 = vector.multi_reduction <maximumf>, %51, %cst_30 [0] : vector<16x16xf32> to vector<16xf32>
    %53 = vector.shape_cast %52 : vector<16xf32> to vector<1x16xf32>
    %54 = vector.broadcast %53 : vector<1x16xf32> to vector<16x16xf32>
    %55 = arith.subf %51, %54 : vector<16x16xf32>
    %56 = math.exp %55 : vector<16x16xf32>
    %cst_31 = arith.constant dense<0.000000e+00> : vector<16xf32>
    %57 = vector.multi_reduction <add>, %56, %cst_31 [0] : vector<16x16xf32> to vector<16xf32>
    %58 = vector.shape_cast %57 : vector<16xf32> to vector<1x16xf32>
    %59 = vector.broadcast %58 : vector<1x16xf32> to vector<16x16xf32>
    %60 = arith.divf %56, %59 : vector<16x16xf32>
    %61 = vector.extract_strided_slice %29 {offsets = [1, 0], sizes = [1, 16], strides = [1, 1]} : vector<4x16xf32> to vector<1x16xf32>
    %62 = vector.broadcast %61 : vector<1x16xf32> to vector<16x16xf32>
    %63 = arith.mulf %60, %62 : vector<16x16xf32>
    %cst_32 = arith.constant dense<0.000000e+00> : vector<1x16xf32>
    %64 = tpu.matmul %30, %63, %cst_32 {dimension_numbers = #tpu.dot_dimension_numbers<[1], [1], [0], [0], [0, 0, 1, 0], [], []>, precision = #tpu.contract_precision<fp32>} : vector<1x16xf32>, vector<16x16xf32>, vector<1x16xf32> -> vector<1x16xf32>
    %65 = arith.addf %47, %64 : vector<1x16xf32>
    %66 = vector.extract_strided_slice %6 {offsets = [16, 0], sizes = [16, 16], strides = [1, 1]} : vector<64x16xf32> to vector<16x16xf32>
    %cst_33 = arith.constant dense<0.000000e+00> : vector<16x16xf32>
    %67 = tpu.matmul %66, %63, %cst_33 {dimension_numbers = #tpu.dot_dimension_numbers<[1], [1], [0], [0], [0, 0, 1, 0], [], []>, precision = #tpu.contract_precision<fp32>} : vector<16x16xf32>, vector<16x16xf32>, vector<16x16xf32> -> vector<16x16xf32>
    %68 = arith.addf %50, %67 : vector<16x16xf32>
    %69 = vector.extract_strided_slice %17 {offsets = [32, 0], sizes = [16, 16], strides = [1, 1]} : vector<64x16xf32> to vector<16x16xf32>
    %cst_34 = arith.constant dense<0xFF800000> : vector<16xf32>
    %70 = vector.multi_reduction <maximumf>, %69, %cst_34 [0] : vector<16x16xf32> to vector<16xf32>
    %71 = vector.shape_cast %70 : vector<16xf32> to vector<1x16xf32>
    %72 = vector.broadcast %71 : vector<1x16xf32> to vector<16x16xf32>
    %73 = arith.subf %69, %72 : vector<16x16xf32>
    %74 = math.exp %73 : vector<16x16xf32>
    %cst_35 = arith.constant dense<0.000000e+00> : vector<16xf32>
    %75 = vector.multi_reduction <add>, %74, %cst_35 [0] : vector<16x16xf32> to vector<16xf32>
    %76 = vector.shape_cast %75 : vector<16xf32> to vector<1x16xf32>
    %77 = vector.broadcast %76 : vector<1x16xf32> to vector<16x16xf32>
    %78 = arith.divf %74, %77 : vector<16x16xf32>
    %79 = vector.extract_strided_slice %29 {offsets = [2, 0], sizes = [1, 16], strides = [1, 1]} : vector<4x16xf32> to vector<1x16xf32>
    %80 = vector.broadcast %79 : vector<1x16xf32> to vector<16x16xf32>
    %81 = arith.mulf %78, %80 : vector<16x16xf32>
    %cst_36 = arith.constant dense<0.000000e+00> : vector<1x16xf32>
    %82 = tpu.matmul %30, %81, %cst_36 {dimension_numbers = #tpu.dot_dimension_numbers<[1], [1], [0], [0], [0, 0, 1, 0], [], []>, precision = #tpu.contract_precision<fp32>} : vector<1x16xf32>, vector<16x16xf32>, vector<1x16xf32> -> vector<1x16xf32>
    %83 = arith.addf %65, %82 : vector<1x16xf32>
    %84 = vector.extract_strided_slice %6 {offsets = [32, 0], sizes = [16, 16], strides = [1, 1]} : vector<64x16xf32> to vector<16x16xf32>
    %cst_37 = arith.constant dense<0.000000e+00> : vector<16x16xf32>
    %85 = tpu.matmul %84, %81, %cst_37 {dimension_numbers = #tpu.dot_dimension_numbers<[1], [1], [0], [0], [0, 0, 1, 0], [], []>, precision = #tpu.contract_precision<fp32>} : vector<16x16xf32>, vector<16x16xf32>, vector<16x16xf32> -> vector<16x16xf32>
    %86 = arith.addf %68, %85 : vector<16x16xf32>
    %87 = vector.extract_strided_slice %17 {offsets = [48, 0], sizes = [16, 16], strides = [1, 1]} : vector<64x16xf32> to vector<16x16xf32>
    %cst_38 = arith.constant dense<0xFF800000> : vector<16xf32>
    %88 = vector.multi_reduction <maximumf>, %87, %cst_38 [0] : vector<16x16xf32> to vector<16xf32>
    %89 = vector.shape_cast %88 : vector<16xf32> to vector<1x16xf32>
    %90 = vector.broadcast %89 : vector<1x16xf32> to vector<16x16xf32>
    %91 = arith.subf %87, %90 : vector<16x16xf32>
    %92 = math.exp %91 : vector<16x16xf32>
    %cst_39 = arith.constant dense<0.000000e+00> : vector<16xf32>
    %93 = vector.multi_reduction <add>, %92, %cst_39 [0] : vector<16x16xf32> to vector<16xf32>
    %94 = vector.shape_cast %93 : vector<16xf32> to vector<1x16xf32>
    %95 = vector.broadcast %94 : vector<1x16xf32> to vector<16x16xf32>
    %96 = arith.divf %92, %95 : vector<16x16xf32>
    %97 = vector.extract_strided_slice %29 {offsets = [3, 0], sizes = [1, 16], strides = [1, 1]} : vector<4x16xf32> to vector<1x16xf32>
    %98 = vector.broadcast %97 : vector<1x16xf32> to vector<16x16xf32>
    %99 = arith.mulf %96, %98 : vector<16x16xf32>
    %cst_40 = arith.constant dense<0.000000e+00> : vector<1x16xf32>
    %100 = tpu.matmul %30, %99, %cst_40 {dimension_numbers = #tpu.dot_dimension_numbers<[1], [1], [0], [0], [0, 0, 1, 0], [], []>, precision = #tpu.contract_precision<fp32>} : vector<1x16xf32>, vector<16x16xf32>, vector<1x16xf32> -> vector<1x16xf32>
    %101 = arith.addf %83, %100 : vector<1x16xf32>
    %102 = vector.extract_strided_slice %6 {offsets = [48, 0], sizes = [16, 16], strides = [1, 1]} : vector<64x16xf32> to vector<16x16xf32>
    %cst_41 = arith.constant dense<0.000000e+00> : vector<16x16xf32>
    %103 = tpu.matmul %102, %99, %cst_41 {dimension_numbers = #tpu.dot_dimension_numbers<[1], [1], [0], [0], [0, 0, 1, 0], [], []>, precision = #tpu.contract_precision<fp32>} : vector<16x16xf32>, vector<16x16xf32>, vector<16x16xf32> -> vector<16x16xf32>
    %104 = arith.addf %86, %103 : vector<16x16xf32>
    %c0_42 = arith.constant 0 : index
    %c0_43 = arith.constant 0 : index
    %105 = vector.load %arg10[%c0_42, %c0_43] : memref<16x16xf32, #tpu.memory_space<vmem>>, vector<16x16xf32>
    %106 = vector.broadcast %101 : vector<1x16xf32> to vector<16x16xf32>
    %107 = arith.mulf %106, %105 : vector<16x16xf32>
    %108 = arith.subf %104, %107 : vector<16x16xf32>
    %109 = math.absf %108 : vector<16x16xf32>
    %cst_44 = arith.constant dense<0.000000e+00> : vector<16xf32>
    %110 = vector.multi_reduction <add>, %109, %cst_44 [0] : vector<16x16xf32> to vector<16xf32>
    %111 = vector.shape_cast %110 : vector<16xf32> to vector<1x16xf32>
    %cst_45 = arith.constant 9.99999996E-13 : f32
    %112 = vector.broadcast %cst_45 : f32 to vector<1x16xf32>
    %113 = arith.maximumf %111, %112 : vector<1x16xf32>
    %114 = vector.broadcast %113 : vector<1x16xf32> to vector<16x16xf32>
    %115 = arith.divf %108, %114 : vector<16x16xf32>
    %c0_46 = arith.constant 0 : index
    %c0_47 = arith.constant 0 : index
    %116 = vector.load %arg11[%c0_46, %c0_47] : memref<1x1xf32, #tpu.memory_space<vmem>>, vector<1x1xf32>
    %117 = vector.broadcast %116 : vector<1x1xf32> to vector<16x16xf32>
    %118 = arith.mulf %115, %117 : vector<16x16xf32>
    %c0_48 = arith.constant 0 : index
    %c0_49 = arith.constant 0 : index
    %119 = vector.load %arg12[%c0_48, %c0_49] : memref<1x1xf32, #tpu.memory_space<vmem>>, vector<1x1xf32>
    %120 = vector.broadcast %119 : vector<1x1xf32> to vector<16x16xf32>
    %121 = arith.addf %118, %120 : vector<16x16xf32>
    %c0_50 = arith.constant 0 : index
    %c0_51 = arith.constant 0 : index
    %c0_52 = arith.constant 0 : index
    %122 = vector.load %arg13[%c0_50, %c0_51, %c0_52] : memref<1x16x16xf32, #tpu.memory_space<vmem>>, vector<1x16x16xf32>
    %123 = vector.shape_cast %122 : vector<1x16x16xf32> to vector<16x16xf32>
    %124 = vector.shape_cast %121 : vector<16x16xf32> to vector<1x16x16xf32>
    tpu.vector_store %arg13[%c0_50, %c0_51, %c0_52], %124 {strides = array<i32>} : memref<1x16x16xf32, #tpu.memory_space<vmem>>, vector<1x16x16xf32>,
    return
  }
  func.func @transform_0(%arg0: i32) -> (i32, i32, i32) {
    %c0_i32 = arith.constant 0 : i32
    %c0_i32_0 = arith.constant 0 : i32
    %c0_i32_1 = arith.constant 0 : i32
    return %arg0, %c0_i32, %c0_i32_0 : i32, i32, i32
  }
  func.func @transform_1(%arg0: i32) -> (i32, i32) {
    %c0_i32 = arith.constant 0 : i32
    %c0_i32_0 = arith.constant 0 : i32
    %c0_i32_1 = arith.constant 0 : i32
    return %c0_i32, %c0_i32_0 : i32, i32
  }
  func.func @transform_2(%arg0: i32) -> (i32, i32) {
    %c0_i32 = arith.constant 0 : i32
    %c0_i32_0 = arith.constant 0 : i32
    %c0_i32_1 = arith.constant 0 : i32
    return %c0_i32, %c0_i32_0 : i32, i32
  }
  func.func @transform_3(%arg0: i32) -> (i32, i32) {
    %c0_i32 = arith.constant 0 : i32
    %c0_i32_0 = arith.constant 0 : i32
    %c0_i32_1 = arith.constant 0 : i32
    return %c0_i32, %c0_i32_0 : i32, i32
  }
  func.func @transform_4(%arg0: i32) -> (i32, i32) {
    %c0_i32 = arith.constant 0 : i32
    %c0_i32_0 = arith.constant 0 : i32
    %c0_i32_1 = arith.constant 0 : i32
    return %c0_i32, %c0_i32_0 : i32, i32
  }
  func.func @transform_5(%arg0: i32) -> (i32, i32) {
    %c0_i32 = arith.constant 0 : i32
    %c0_i32_0 = arith.constant 0 : i32
    %c0_i32_1 = arith.constant 0 : i32
    return %c0_i32, %c0_i32_0 : i32, i32
  }
  func.func @transform_6(%arg0: i32) -> (i32, i32) {
    %c0_i32 = arith.constant 0 : i32
    %c0_i32_0 = arith.constant 0 : i32
    %c0_i32_1 = arith.constant 0 : i32
    return %c0_i32, %c0_i32_0 : i32, i32
  }
  func.func @transform_7(%arg0: i32) -> (i32, i32) {
    %c0_i32 = arith.constant 0 : i32
    %c0_i32_0 = arith.constant 0 : i32
    %c0_i32_1 = arith.constant 0 : i32
    return %c0_i32, %c0_i32_0 : i32, i32
  }
  func.func @transform_8(%arg0: i32) -> (i32, i32) {
    %c0_i32 = arith.constant 0 : i32
    %c0_i32_0 = arith.constant 0 : i32
    %c0_i32_1 = arith.constant 0 : i32
    return %c0_i32, %c0_i32_0 : i32, i32
  }
  func.func @transform_9(%arg0: i32) -> (i32, i32) {
    %c0_i32 = arith.constant 0 : i32
    %c0_i32_0 = arith.constant 0 : i32
    %c0_i32_1 = arith.constant 0 : i32
    return %c0_i32, %c0_i32_0 : i32, i32
  }
  func.func @transform_10(%arg0: i32) -> (i32, i32) {
    %c0_i32 = arith.constant 0 : i32
    %c0_i32_0 = arith.constant 0 : i32
    %c0_i32_1 = arith.constant 0 : i32
    return %c0_i32, %c0_i32_0 : i32, i32
  }
  func.func @transform_11(%arg0: i32) -> (i32, i32) {
    %c0_i32 = arith.constant 0 : i32
    %c0_i32_0 = arith.constant 0 : i32
    %c0_i32_1 = arith.constant 0 : i32
    return %c0_i32, %c0_i32_0 : i32, i32
  }
  func.func @transform_12(%arg0: i32) -> (i32, i32, i32) {
    %c0_i32 = arith.constant 0 : i32
    %c0_i32_0 = arith.constant 0 : i32
    %c0_i32_1 = arith.constant 0 : i32
    return %arg0, %c0_i32, %c0_i32_0 : i32, i32, i32
  }
}

</mosaic_0001>

<bundles_post_ra>
// kernel: tpu_custom_call.1
= control target key start
LH: loop header
LB: loop body
LE: loop exit
PB: predicated region body
PF: predicated region fallthrough
CT: control target
= control target key end

     0   :  { %s4856_s0 = inlined_call_operand.vmem [shape: f32[2,32,16], index: 0, kind: input, shape index: {}]   ;;  %s4857_s1 = inlined_call_operand.vmem [shape: f32[64,32], index: 1, kind: input, shape index: {}]   ;;  %s4858_s2 = inlined_call_operand.vmem [shape: f32[64,1], index: 2, kind: input, shape index: {}]   ;;  %s4859_s3 = inlined_call_operand.vmem [shape: f32[64,64], index: 3, kind: input, shape index: {}]   ;;  %s4860_s4 = inlined_call_operand.vmem [shape: f32[64,1], index: 4, kind: input, shape index: {}]   ;;  %s4861_s5 = inlined_call_operand.vmem [shape: f32[4,64], index: 5, kind: input, shape index: {}]   ;;  %s4862_s6 = inlined_call_operand.vmem [shape: f32[4,1], index: 6, kind: input, shape index: {}]   ;;  %s4863_s7 = inlined_call_operand.vmem [shape: f32[1,16], index: 7, kind: input, shape index: {}]   ;;  %s4864_s8 = inlined_call_operand.vmem [shape: f32[1,16], index: 8, kind: input, shape index: {}]   ;;  %s4865_s9 = inlined_call_operand.vmem [shape: f32[16,16], index: 9, kind: input, shape index: {}]   ;;  %s4866_s10 = inlined_call_operand.<no memory space> [shape: f32[1,1], index: 10, kind: input, shape index: {}]   ;;  %s4867_s12 = inlined_call_operand.hbm [shape: f32[2,16,16], index: 12, kind: output, shape index: {}]   ;;  %s4868_s11 = inlined_call_operand.<no memory space> [shape: f32[1,1], index: 11, kind: input, shape index: {}]  }
   0x1   :  { %v17_v0 = vstv %s4866_s10  ;;  %v19_v1 = vstv %s4868_s11 }
   0x2   :  { %18 = vst [vmem:[#allocation2] sm:$0x1] %v17_v0 }
   0x3   :  { %20 = vst [vmem:[#allocation3] sm:$0x1] %v19_v1 }
   0x4   :  { %21 = vsyncpa [#allocation5], 0 }
   0x5   :  { %23 = vsyncpa [#allocation5 + $0x1], 0  ;;  %s3740_s25 = smov 0   ;;  %s3742_s26 = smov 0  }
   0x6   :  { %s3744_s27 = smov 0   ;;  %s3746_s28 = smov 0  }
   0x7 LB: > { %s3761_s10 = sadd.s32 4294967295, %s3663_s28   ;;  %s3487_s11 = sadd.s32 4294967294, %s3663_s28   ;;  %s3663_s28 = sphi %s3746_s28, %s4884_s28   ;;  %s3659_s27 = sphi %s3744_s27, %s4883_s27   ;;  %s3655_s26 = sphi %s3742_s26, %s4882_s26   ;;  %s3651_s25 = sphi %s3740_s25, %s4881_s25  }
   0x8   : > { %s3765_s29 = sadd.s32 1, %s3663_s28   ;;  %s293_s30 = sadd.s32 1, %s3659_s27 }
   0x9   : > { %s290_s13 = ssub.s32 %s3663_s28, %s3765_s29  ;;  %p303_p0 = scmp.ne.s32.totalorder %s3659_s27, %s3655_s26 }
   0xa   : > { %p291_p1 = scmp.eq.s32.totalorder %s290_s13, 0  ;;  %p304_p2 = scmp.eq.s32.totalorder %s3761_s10, 1 }
   0xb   : > { %p309_p3 = scmp.ne.s32.totalorder %s3655_s26, %s3651_s25  ;;  %p310_p4 = scmp.eq.s32.totalorder %s3487_s11, 1 }
   0xc   : > { %s3776_s14 = scalar_select %p291_p1, %s3659_s27, %s293_s30  }
   0xd   : > { %p3778_p5 = por %p304_p2, %p303_p0  ;;  %p3782_p6 = por %p310_p4, %p309_p3 }
   0xe   : > { %p3490_p7 = scmp.ge.s32.totalorder %s3663_s28, 1  ;;  %p369_p8 = scmp.lt.s32.totalorder %s3663_s28, 3 }
  0x10   : > { %p370_p9 = pnand %p3490_p7, %p369_p8 }
  0x12   : > { %373 = sbr.rel (%p370_p9) target bundleno = 970 (0x3ca), region = 68 }
  0x17   : > { %p411_p10 = scmp.lt.s32.totalorder %s3761_s10, 1  ;;  %v420_v2 = vld [vmem:[%s4857_s1] sm:$0xff]  ;;  %vm476_vm0 = vcmask 261120   ;;  %v427_v3 = vld [vmem:[%s4857_s1 + $0x38] sm:$0xff]  ;;  %v4869_v4 = vmov 0   ;;  %v433_v7 = vld [vmem:[%s4858_s2 + $0x28] sm:$0xff] }
  0x18   : > { %3565 = vset.pattern.permute.xlu1 %v4869_v4  ;;  %v478_v5 = vsel %vm476_vm0, %v420_v2, 0  ;;  %v499_v6 = vsel %vm476_vm0, %v427_v3, 0  ;;  %3564 = vset.pattern.permute.xlu0 %v4869_v4  ;;  %v421_v8 = vld [vmem:[%s4857_s1 + $0x8] sm:$0xff]  ;;  %v435_v9 = vld [vmem:[%s4858_s2 + $0x38] sm:$0xff]  ;;  %v422_v16 = vld [vmem:[%s4857_s1 + $0x10] sm:$0xff]  ;;  %vm959_vm1 = vcmask 523264  }
  0x19   : > { %s412_s13 = scalar_select %p411_p10, %s3761_s10, 1  ;;  %v3809_v10 = vand.u32 4294901760, %v478_v5  ;;  %v3811_v11 = vand.u32 4294901760, %v499_v6  ;;  %463 = vperm.xlu1 %3565, %v433_v7   ;;  %v481_v12 = vsel %vm476_vm0, %v421_v8, 0  ;;  %473 = vperm.xlu0 %3564, %v435_v9   ;;  %v432_v17 = vld [vmem:[%s4858_s2 + $0x20] sm:$0xff]  ;;  %v484_v27 = vsel %vm476_vm0, %v422_v16, 0 }
  0x1a   : > { %3566 = vset.pattern.permute.xlu2 %v4869_v4  ;;  %v3821_v15 = vand.u32 4294901760, %v481_v12  ;;  %v434_v28 = vld [vmem:[%s4858_s2 + $0x30] sm:$0xff]  ;;  %v3868_v40 = vand.u32 4294901760, %v484_v27  ;;  %v423_v48 = vld [vmem:[%s4857_s1 + $0x18] sm:$0xff]  ;;  %v428_v52 = vld [vmem:[%s4858_s2] sm:$0xff]  ;;  %vm1728_vm2 = vcmask 130048  }
  0x1b   : > { %s3511_s17 = sshll.u32 %s412_s13, 5  ;;  %v3816_v13 = vsub.f32 %v478_v5, %v3809_v10  ;;  %v3819_v14 = vsub.f32 %v499_v6, %v3811_v11  ;;  %v487_v56 = vsel %vm476_vm0, %v423_v48, 0  ;;  %v429_v57 = vld [vmem:[%s4858_s2 + $0x8] sm:$0xff]  ;;  %v424_v62 = vld [vmem:[%s4857_s1 + $0x20] sm:$0xff]  ;;  %s408_s21 = sand.u32 1, %s3655_s26  }
  0x1c   : > { %s415_s22 = scalar_lea.vmem %s4856_s0, %s3511_s17  ;;  %v3853_v32 = vsub.f32 %v481_v12, %v3821_v15  ;;  %v3888_v54 = vsub.f32 %v484_v27, %v3868_v40  ;;  %v3895_v61 = vand.u32 4294901760, %v487_v56  ;;  %v490_v1 = vsel %vm476_vm0, %v424_v62, 0  ;;  %v425_v6 = vld [vmem:[%s4857_s1 + $0x28] sm:$0xff]  ;;  %v431_v12 = vld [vmem:[%s4858_s2 + $0x18] sm:$0xff]  ;;  %s3512_s23 = sshll.u32 %s3761_s10, 4 }
  0x1d   : > { %v419_v18 = vld [vmem:[%s415_s22 + $0x18] sm:$0xff]  ;;  %v418_v19 = vld [vmem:[%s415_s22 + $0x10] sm:$0xff]  ;;  %v417_v20 = vld [vmem:[%s415_s22 + $0x8] sm:$0xff]  ;;  %v523_v21 = vand.u32 4294901760, %v3816_v13  ;;  %v579_v22 = vand.u32 4294901760, %v3819_v14  ;;  %v3911_v5 = vand.u32 4294901760, %v490_v1  ;;  %453 = vperm.xlu2 %3566, %v431_v12   ;;  %s3421_s30 = scalar_lea.hbm %s4867_s12, %s3512_s23 }
  0x1e   : > { %v3834_v23 = vand.u32 4294901760, %v419_v18  ;;  %v3836_v24 = vand.u32 4294901760, %v418_v19  ;;  %v3838_v25 = vand.u32 4294901760, %v417_v20  ;;  %v416_v26 = vld [vmem:[%s415_s22] sm:$0xff]  ;;  %v531_v44 = vand.u32 4294901760, %v3853_v32  ;;  %s3491_s22 = sshll.u32 %s408_s21, 4 }
  0x1f   : > { %v3844_v29 = vand.u32 4294901760, %v416_v26  ;;  %v524_v30 = vsub.f32 %v3816_v13, %v523_v21  ;;  %v580_v31 = vsub.f32 %v3819_v14, %v579_v22  ;;  %v539_v60 = vand.u32 4294901760, %v3888_v54  ;;  %s410_s13 = scalar_lea.vmem [#allocation4], %s3491_s22  ;;  %s3424_s18 = sshll.u32 %s3421_s30, 4  ;;  %s3425_s18 = int_to_ptr.hbm [resolvable:$true] %s3424_s18 }
  0x20   : > { %514 = vmatpush.msra.mxu0 %v3834_v23  ;;  %3513 = vmatpush.msra.mxu2 %v3834_v23  ;;  %v599_v33 = vsub.f32 %v419_v18, %v3834_v23  ;;  %v605_v34 = vsub.f32 %v418_v19, %v3836_v24  ;;  %v3860_v35 = vsub.f32 %v417_v20, %v3838_v25  ;;  %v493_v9 = vsel %vm476_vm0, %v425_v6, 0  ;;  %s3422_s17 = sshll.u32 %s410_s13, 4  ;;  %s3410_s10 = scalar_lea.sflag [#allocation5], %s408_s21  ;;  %s3423_s17 = int_to_ptr.vmem [resolvable:$true] %s3422_s17 }
  0x21   : > { %v3863_v36 = vsub.f32 %v416_v26, %v3844_v29  ;;  %458 = vperm.xlu1 %3565, %v432_v17   ;;  %468 = vperm.xlu0 %3564, %v434_v28   ;;  %v525_v41 = vand.u32 4294901760, %v524_v30  ;;  %v581_v42 = vand.u32 4294901760, %v580_v31  ;;  %v532_v53 = vsub.f32 %v3853_v32, %v531_v44  ;;  %s3615_s19 = sshra.s32 %s3425_s18, 4  ;;  %s3621_s24 = scalar_lea.hbm %s4867_s12, 32  ;;  %s3616_s19 = int_to_ptr.hbm [resolvable:$true] %s3615_s19 }
  0x22   : > { %516 = vmatpush.msra.mxu0 %v3836_v24  ;;  %3514 = vmatpush.msra.mxu2 %v3836_v24  ;;  %v600_v37 = vand.u32 4294901760, %v599_v33  ;;  %v606_v38 = vand.u32 4294901760, %v605_v34  ;;  %v612_v39 = vand.u32 4294901760, %v3860_v35  ;;  %v540_v63 = vsub.f32 %v3888_v54, %v539_v60  ;;  %s3617_s20 = scalar_lea.hbm %s3616_s19, 16  ;;  %p3622_p0 = scmp.lt.s32.totalorder %s3616_s19, %s4867_s12 }
  0x23   : > { %v618_v43 = vand.u32 4294901760, %v3863_v36  ;;  %v533_v59 = vand.u32 4294901760, %v532_v53  ;;  %v546_v0 = vsub.f32 %v487_v56, %v3895_v61  ;;  %v554_v8 = vsub.f32 %v490_v1, %v3911_v5  ;;  %p3618_p11 = scmp.ne.s32.totalorder %s3616_s19, %s3617_s20  ;;  %p3623_p1 = scmp.lt.s32.totalorder %s3621_s24, %s3617_s20 }
  0x24   : > { %518 = vmatpush.msra.mxu0 %v3838_v25  ;;  %3515 = vmatpush.msra.mxu2 %v3838_v25  ;;  %v601_v45 = vsub.f32 %v599_v33, %v600_v37  ;;  %v607_v46 = vsub.f32 %v605_v34, %v606_v38  ;;  %v613_v47 = vsub.f32 %v3860_v35, %v612_v39  ;;  %v541_v2 = vand.u32 4294901760, %v540_v63 }
  0x25   : > { %v619_v51 = vsub.f32 %v3863_v36, %v618_v43  ;;  %v547_v3 = vand.u32 4294901760, %v546_v0  ;;  %v555_v17 = vand.u32 4294901760, %v554_v8  ;;  %v3930_v18 = vand.u32 4294901760, %v493_v9  ;;  %p3619_p12 = pnand %p3618_p11, %p3778_p5  ;;  %p3624_p2 = por %p3623_p1, %p3622_p0 }
  0x26   : > { %520 = vmatpush.msra.mxu0 %v3844_v29  ;;  %3516 = vmatpush.msra.mxu2 %v3844_v29  ;;  %v602_v49 = vand.u32 4294901760, %v601_v45  ;;  %v608_v50 = vand.u32 4294901760, %v607_v46  ;;  %v614_v55 = vand.u32 4294901760, %v613_v47 }
  0x27   : > { %526 = vmatmul.f32.vlgmr.msra.gmra.mxu0 %v525_v41  ;;  %582 = vmatmul.f32.vlgmr.msra.gmra.mxu2 %v581_v42  ;;  %v620_v58 = vand.u32 4294901760, %v619_v51  ;;  %v548_v7 = vsub.f32 %v546_v0, %v547_v3  ;;  %v556_v19 = vsub.f32 %v554_v8, %v555_v17  ;;  %v562_v20 = vsub.f32 %v493_v9, %v3930_v18  ;;  %p3620_p13 = pneg %p3619_p12 }
  0x28   : > { %603 = vmatpush.msra.mxu1 %v602_v49  ;;  %3517 = vmatpush.msra.mxu3 %v602_v49 }
  0x29   : > { %669 = vmatpush.msrb.mxu2 %v599_v33  ;;  %438 = vperm.xlu1 %3565, %v428_v52   ;;  %v549_v16 = vand.u32 4294901760, %v548_v7  ;;  %v914_v33 = vld [vmem:[%s4860_s4 + $0x18] sm:$0xff]  ;;  %p3625_p3 = pnand %p3624_p2, %p3620_p13 }
  0x2a   : > { %609 = vmatpush.msra.mxu1 %v608_v50  ;;  %3518 = vmatpush.msra.mxu3 %v608_v50 }
  0x2b   : > { %672 = vmatpush.msrb.mxu2 %v605_v34  ;;  %443 = vperm.xlu0 %3564, %v429_v57   ;;  %v1463_v34 = vld [vmem:[%s4862_s6] sm:$0xf] }
  0x2c   : > { %615 = vmatpush.msra.mxu1 %v614_v55  ;;  %3519 = vmatpush.msra.mxu3 %v614_v55 }
  0x2d   : > { %675 = vmatpush.msrb.mxu2 %v3860_v35  ;;  %804 = vmatpush.msrb.mxu0 %v600_v37  ;;  %v911_v35 = vld [vmem:[%s4860_s4] sm:$0xff] }
  0x2e   : > { %621 = vmatpush.msra.mxu1 %v620_v58  ;;  %3520 = vmatpush.msra.mxu3 %v620_v58  ;;  %v3567_v37 = vld [vmem:[#allocation3] ss:$0 sm:$0xff] }
  0x2f   : > { %678 = vmatpush.msrb.mxu2 %v3863_v36  ;;  %534 = vmatmul.f32.gmra.mxu0 %v533_v59  ;;  %v915_v36 = vld [vmem:[%s4860_s4 + $0x20] sm:$0xff] }
  0x30   : > { %623 = vmatmul.f32.vlgmr.msra.gmra.mxu1 %v3809_v10  ;;  %651 = vmatmul.f32.vlgmr.msra.gmra.mxu3 %v3811_v11 }
  0x31   : > { %681 = vmatmul.f32.vlgmr.msrb.gmra.mxu2 %v3816_v13  ;;  %733 = vmatpush.msrb.mxu3 %v3834_v23  ;;  %v426_v13 = vld [vmem:[%s4857_s1 + $0x30] sm:$0xff] }
  0x32   : > { %808 = vmatpush.msrb.mxu0 %v606_v38  ;;  %863 = vmatpush.msrb.mxu1 %v3834_v23  ;;  %v430_v23 = vld [vmem:[%s4858_s2 + $0x10] sm:$0xff]  ;;  %v916_v38 = vld [vmem:[%s4860_s4 + $0x28] sm:$0xff] }
  0x33   : > { %735 = vmatpush.msrb.mxu3 %v3836_v24  ;;  %448 = vperm.xlu2 %3566, %v430_v23  }
  0x34   : > { %812 = vmatpush.msrb.mxu0 %v612_v39  ;;  %865 = vmatpush.msrb.mxu1 %v3836_v24  ;;  %v557_v24 = vand.u32 4294901760, %v556_v19  ;;  %v3568_v39 = vld [vmem:[#allocation2] ss:$0 sm:$0xff] }
  0x35   : > { %737 = vmatpush.msrb.mxu3 %v3838_v25  ;;  %936 = vperm.xlu0 %3564, %v914_v33  }
  0x36   : > { %816 = vmatpush.msrb.mxu0 %v618_v43  ;;  %867 = vmatpush.msrb.mxu1 %v3838_v25  ;;  %v563_v25 = vand.u32 4294901760, %v562_v20 }
  0x37   : > { %739 = vmatpush.msrb.mxu3 %v3844_v29  ;;  %542 = vmatmul.f32.gmra.mxu0 %v541_v2 }
  0x38   : > { %627 = vmatmul.f32.gmra.mxu1 %v3821_v15  ;;  %743 = vmatmul.f32.vlgmr.msrb.gmra.mxu3 %v523_v21  ;;  %v496_v21 = vsel %vm476_vm0, %v426_v13, 0  ;;  %v564_v27 = vsub.f32 %v562_v20, %v563_v25 }
  0x39   : > { %686 = vmatmul.f32.gmra.mxu2 %v3853_v32  ;;  %869 = vmatpush.msrb.mxu1 %v3844_v29  ;;  %v569_v26 = vand.u32 4294901760, %v496_v21 }
  0x3a   : > { %v565_v29 = vand.u32 4294901760, %v564_v27  ;;  %921 = vperm.xlu1 %3565, %v911_v35  }
  0x3b   : > { %v570_v28 = vsub.f32 %v496_v21, %v569_v26 }
  0x3d   : > { %v571_v30 = vand.u32 4294901760, %v570_v28  ;;  %1466 = vperm.xlu0 %3564, %v1463_v34  }
  0x3f   : > { %550 = vmatmul.f32.gmra.mxu0 %v549_v16  ;;  %v572_v31 = vsub.f32 %v570_v28, %v571_v30 }
  0x40   : > { %631 = vmatmul.f32.gmra.mxu1 %v3868_v40  ;;  %749 = vmatmul.f32.gmra.mxu3 %v531_v44 }
  0x41   : > { %691 = vmatmul.f32.gmra.mxu2 %v3888_v54  ;;  %v573_v32 = vand.u32 4294901760, %v572_v31 }
  0x42   : > { %941 = vperm.xlu1 %3565, %v915_v36  }
  0x47   : > { %558 = vmatmul.f32.gmra.mxu0 %v557_v24 }
  0x48   : > { %635 = vmatmul.f32.gmra.mxu1 %v3895_v61  ;;  %755 = vmatmul.f32.gmra.mxu3 %v539_v60 }
  0x49   : > { %696 = vmatmul.f32.gmra.mxu2 %v546_v0 }
  0x4f   : > { %566 = vmatmul.f32.gmra.mxu0 %v565_v29 }
  0x50   : > { %639 = vmatmul.f32.gmra.mxu1 %v3911_v5  ;;  %761 = vmatmul.f32.gmra.mxu3 %v547_v3 }
  0x51   : > { %701 = vmatmul.f32.gmra.mxu2 %v554_v8 }
  0x57   : > { %574 = vmatmul.f32.gmra.mxu0 %v573_v32 }
  0x58   : > { %643 = vmatmul.f32.gmra.mxu1 %v3930_v18  ;;  %767 = vmatmul.f32.gmra.mxu3 %v555_v17 }
  0x59   : > { %706 = vmatmul.f32.gmra.mxu2 %v562_v20 }
  0x5f   : > { %818 = vmatmul.f32.vlgmr.msrb.gmra.mxu0 %v3809_v10 }
  0x60   : > { %647 = vmatmul.f32.gmra.mxu1 %v569_v26  ;;  %773 = vmatmul.f32.gmra.mxu3 %v563_v25 }
  0x61   : > { %711 = vmatmul.f32.gmra.mxu2 %v570_v28 }
  0x67   : > { %822 = vmatmul.f32.gmra.mxu0 %v3821_v15 }
  0x68   : > { %779 = vmatmul.f32.gmra.mxu3 %v571_v30  ;;  %871 = vmatmul.f32.vlgmr.msrb.gmra.mxu1 %v3809_v10  ;;  %v917_v10 = vld [vmem:[%s4860_s4 + $0x30] sm:$0xff] }
  0x69   : > { %716 = vmatmul.f32.gmra.mxu2 %v3819_v14  ;;  %951 = vperm.xlu0 %3564, %v917_v10   ;;  %v918_v14 = vld [vmem:[%s4860_s4 + $0x38] sm:$0xff] }
  0x6a   : > { %956 = vperm.xlu1 %3565, %v918_v14  }
  0x6f   : > { %826 = vmatmul.f32.gmra.mxu0 %v3868_v40 }
  0x70   : > { %785 = vmatmul.f32.gmra.mxu3 %v579_v22  ;;  %875 = vmatmul.f32.gmra.mxu1 %v3821_v15  ;;  %v913_v15 = vld [vmem:[%s4860_s4 + $0x10] sm:$0xff]  ;;  %v912_v22 = vld [vmem:[%s4860_s4 + $0x8] sm:$0xff] }
  0x71   : > { %3402 = vperm.xlu0 %3564, %v3567_v37   ;;  %931 = vperm.xlu2 %3566, %v913_v15  }
  0x77   : > { %830 = vmatmul.f32.gmra.mxu0 %v3895_v61  ;;  %v454_v21 = vpop.permute.xlu2 %453 }
  0x78   : > { %879 = vmatmul.f32.gmra.mxu1 %v3868_v40 }
  0x79   : > { %926 = vperm.xlu2 %3566, %v912_v22  }
  0x7f   : > { %834 = vmatmul.f32.gmra.mxu0 %v3911_v5 }
  0x80   : > { %883 = vmatmul.f32.gmra.mxu1 %v3895_v61 }
  0x81   : > { %946 = vperm.xlu2 %3566, %v916_v38  }
  0x87   : > { %838 = vmatmul.f32.gmra.mxu0 %v3930_v18 }
  0x88   : > { %887 = vmatmul.f32.gmra.mxu1 %v3911_v5 }
  0x89   : > { %3393 = vperm.xlu2 %3566, %v3568_v39  }
  0x8b   : > { %v474_v16 = vpop.permute.xlu0 %473 }
  0x8d   : > { %v449_v33 = vpop.permute.xlu2 %448 }
  0x8f   : > { %842 = vmatmul.f32.gmra.mxu0 %v569_v26 }
  0x90   : > { %891 = vmatmul.f32.gmra.mxu1 %v3930_v18  ;;  %v464_v18 = vpop.permute.xlu1 %463 }
  0x93   : > { %v469_v23 = vpop.permute.xlu0 %468 }
  0x97   : > { %846 = vmatmul.f32.gmra.mxu0 %v3811_v11 }
  0x98   : > { %895 = vmatmul.f32.gmra.mxu1 %v569_v26  ;;  %v459_v26 = vpop.permute.xlu1 %458 }
  0x9d   : > { %v444_v38 = vpop.permute.xlu0 %443 }
  0xa0   : > { %899 = vmatmul.f32.gmra.mxu1 %v3811_v11 }
  0xa4   : > { %v3991_v40 = vpop.f32.mrf.mxu0 }
  0xaa   : > { %v583_v48 = vpop.f32.mrf.mxu2 }
  0xab   : > { %v584_v36 = vadd.f32 %v583_v48, %v474_v16 }
  0xac   : > { %v3993_v41 = vpop.f32.mrf.mxu0 }
  0xad   : > { %v3995_v42 = vpop.f32.mrf.mxu1 }
  0xb3   : > { %v652_v50 = vpop.f32.mrf.mxu3 }
  0xb4   : > { %v543_v43 = vpop.f32.mrf.mxu0  ;;  %v4001_v53 = vpop.f32.mrf.mxu2 }
  0xb5   : > { %v3997_v44 = vpop.f32.mrf.mxu1  ;;  %v544_v22 = vadd.f32 %v543_v43, %v449_v33 }
  0xbb   : > { %v4003_v11 = vpop.f32.mrf.mxu3 }
  0xbc   : > { %v551_v45 = vpop.f32.mrf.mxu0  ;;  %v4005_v56 = vpop.f32.mrf.mxu2 }
  0xbd   : > { %v3999_v46 = vpop.f32.mrf.mxu1  ;;  %v552_v10 = vadd.f32 %v551_v45, %v454_v21  ;;  %v536_v45 = vadd.f32 %v3993_v41, %v444_v38 }
  0xbe   : > { %v633_v48 = vadd.f32 %v3999_v46, %v544_v22 }
  0xbf   : > { %v629_v46 = vadd.f32 %v3997_v44, %v536_v45 }
  0xc3   : > { %v4007_v57 = vpop.f32.mrf.mxu3 }
  0xc4   : > { %v559_v47 = vpop.f32.mrf.mxu0  ;;  %v692_v60 = vpop.f32.mrf.mxu2 }
  0xc5   : > { %v636_v49 = vpop.f32.mrf.mxu1  ;;  %v560_v30 = vadd.f32 %v559_v47, %v459_v26  ;;  %v653_v47 = vadd.f32 %v652_v50, %v584_v36 }
  0xc6   : > { %v637_v4 = vadd.f32 %v636_v49, %v552_v10  ;;  %v903_v49 = vld [vmem:[%s4859_s3] sm:$0xff] }
  0xc7   : > { %v961_v21 = vsel %vm959_vm1, %v903_v49, 0 }
  0xcb   : > { %v4013_v62 = vpop.f32.mrf.mxu3 }
  0xcc   : > { %v567_v51 = vpop.f32.mrf.mxu0  ;;  %v697_v1 = vpop.f32.mrf.mxu2 }
  0xcd   : > { %v640_v52 = vpop.f32.mrf.mxu1  ;;  %v568_v27 = vadd.f32 %v567_v51, %v464_v18 }
  0xce   : > { %v641_v37 = vadd.f32 %v640_v52, %v560_v30  ;;  %v698_v52 = vadd.f32 %v697_v1, %v637_v4 }
  0xd3   : > { %v762_v3 = vpop.f32.mrf.mxu3 }
  0xd4   : > { %v575_v54 = vpop.f32.mrf.mxu0  ;;  %v702_v7 = vpop.f32.mrf.mxu2 }
  0xd5   : > { %v644_v55 = vpop.f32.mrf.mxu1  ;;  %v576_v24 = vadd.f32 %v575_v54, %v469_v23  ;;  %v703_v39 = vadd.f32 %v702_v7, %v641_v37 }
  0xd6   : > { %v645_v34 = vadd.f32 %v644_v55, %v568_v27 }
  0xdb   : > { %v768_v8 = vpop.f32.mrf.mxu3 }
  0xdc   : > { %v4009_v58 = vpop.f32.mrf.mxu0  ;;  %v707_v17 = vpop.f32.mrf.mxu2 }
  0xdd   : > { %v648_v59 = vpop.f32.mrf.mxu1  ;;  %v708_v14 = vadd.f32 %v707_v17, %v645_v34  ;;  %v763_v17 = vadd.f32 %v762_v3, %v698_v52 }
  0xde   : > { %v649_v31 = vadd.f32 %v648_v59, %v576_v24  ;;  %v769_v59 = vadd.f32 %v768_v8, %v703_v39  ;;  %v693_v8 = vadd.f32 %v692_v60, %v633_v48 }
  0xe0   : > { %v757_v1 = vadd.f32 %v4013_v62, %v693_v8 }
  0xe3   : > { %v774_v13 = vpop.f32.mrf.mxu3 }
  0xe4   : > { %v4011_v61 = vpop.f32.mrf.mxu0  ;;  %v712_v25 = vpop.f32.mrf.mxu2  ;;  %v775_v54 = vadd.f32 %v774_v13, %v708_v14 }
  0xe5   : > { %v4015_v63 = vpop.f32.mrf.mxu1  ;;  %v713_v35 = vadd.f32 %v712_v25, %v649_v31 }
  0xe6   : > { %4872 = vst [vmem:[#allocation7_spill] sm:$0xff] %v4015_v63  ;;  %v439_v63 = vpop.permute.xlu1 %438 }
  0xe7   : > { %v528_v50 = vadd.f32 %v3991_v40, %v439_v63  ;;  %v688_v63 = vadd.f32 %v4005_v56, %v629_v46 }
  0xe9   : > { %v625_v60 = vadd.f32 %v3995_v42, %v528_v50  ;;  %v751_v56 = vadd.f32 %v4007_v57, %v688_v63  ;;  %v905_v50 = vld [vmem:[%s4859_s3 + $0x10] sm:$0xff] }
  0xeb   : > { %v780_v28 = vpop.f32.mrf.mxu3  ;;  %v683_v42 = vadd.f32 %v4001_v53, %v625_v60  ;;  %v824_v31 = vadd.f32 %v4011_v61, %v751_v56  ;;  %v904_v53 = vld [vmem:[%s4859_s3 + $0x8] sm:$0xff] }
  0xec   : > { %v4017_v0 = vpop.f32.mrf.mxu0  ;;  %v781_v15 = vadd.f32 %v780_v28, %v713_v35  ;;  %v717_v51 = vpop.f32.mrf.mxu2  ;;  %v4061_v28 = vand.u32 4294901760, %v961_v21  ;;  %v964_v37 = vsel %vm959_vm1, %v904_v53, 0 }
  0xed   : > { %v4019_v2 = vpop.f32.mrf.mxu1  ;;  %v718_v43 = vadd.f32 %v717_v51, %v653_v47  ;;  %v828_v3 = vadd.f32 %v4017_v0, %v757_v1  ;;  %v745_v30 = vadd.f32 %v4003_v11, %v683_v42  ;;  %v4873_v14 = vld [vmem:[#allocation7_spill] sm:$0xff] }
  0xee   : > { %v4097_v61 = vsub.f32 %v961_v21, %v4061_v28  ;;  %v4101_v34 = vadd.f32 %v4019_v2, %v824_v31 }
  0xef   : > { %v820_v33 = vadd.f32 %v4009_v58, %v745_v30 }
  0xf0   : > { %v1010_v39 = vand.u32 4294901760, %v4097_v61 }
  0xf1   : > { %v4116_v58 = vadd.f32 %v4873_v14, %v820_v33 }
  0xf2   : > { %v1011_v52 = vsub.f32 %v4097_v61, %v1010_v39 }
  0xf3   : > { %v786_v55 = vpop.f32.mrf.mxu3 }
  0xf4   : > { %v831_v5 = vpop.f32.mrf.mxu0 }
  0xf5   : > { %v4021_v6 = vpop.f32.mrf.mxu1 }
  0xf6   : > { %v4066_v0 = vadd.f32 %v4021_v6, %v828_v3 }
  0xf8   : > { %v4104_v35 = vand.u32 4294901760, %v4066_v0 }
  0xfa   : > { %v4141_v51 = vsub.f32 %v4066_v0, %v4104_v35 }
  0xfc   : > { %v835_v9 = vpop.f32.mrf.mxu0  ;;  %v4169_v49 = vand.u32 4294901760, %v4141_v51 }
  0xfd   : > { %v4023_v12 = vpop.f32.mrf.mxu1  ;;  %v836_v16 = vadd.f32 %v835_v9, %v769_v59  ;;  %v832_v9 = vadd.f32 %v831_v5, %v763_v17  ;;  %v4148_v59 = vand.u32 4294901760, %v4116_v58 }
  0xfe   : > { %v1114_v21 = vsub.f32 %v4141_v51, %v4169_v49 }
  0xff   : > { %v4176_v8 = vsub.f32 %v4116_v58, %v4148_v59 }
 0x100   : > { %v1115_v42 = vand.u32 4294901760, %v1114_v21 }
 0x101   : > { %v4196_v60 = vand.u32 4294901760, %v4176_v8 }
 0x103   : > { %v1126_v56 = vsub.f32 %v4176_v8, %v4196_v60 }
 0x104   : > { %v839_v19 = vpop.f32.mrf.mxu0 }
 0x105   : > { %v888_v20 = vpop.f32.mrf.mxu1  ;;  %v840_v24 = vadd.f32 %v839_v19, %v775_v54  ;;  %v787_v19 = vadd.f32 %v786_v55, %v718_v43  ;;  %v4134_v54 = vand.u32 4294901760, %v4101_v34  ;;  %v1127_v33 = vand.u32 4294901760, %v1126_v56 }
 0x106   : > { %v4035_v41 = vadd.f32 %v888_v20, %v836_v16  ;;  %v4050_v20 = vadd.f32 %v4023_v12, %v832_v9  ;;  %v967_v9 = vsel %vm959_vm1, %v905_v50, 0 }
 0x107   : > { %v4160_v55 = vsub.f32 %v4101_v34, %v4134_v54  ;;  %v4198_v63 = vand.u32 4294901760, %v967_v9 }
 0x108   : > { %v4053_v44 = vand.u32 4294901760, %v4035_v41 }
 0x109   : > { %v4186_v46 = vand.u32 4294901760, %v4160_v55  ;;  %v4211_v30 = vsub.f32 %v967_v9, %v4198_v63 }
 0x10a   : > { %v4085_v57 = vsub.f32 %v4035_v41, %v4053_v44 }
 0x10b   : > { %v1120_v3 = vsub.f32 %v4160_v55, %v4186_v46 }
 0x10c   : > { %v843_v32 = vpop.f32.mrf.mxu0  ;;  %v4130_v38 = vand.u32 4294901760, %v4085_v57 }
 0x10d   : > { %v892_v29 = vpop.f32.mrf.mxu1  ;;  %v844_v23 = vadd.f32 %v843_v32, %v781_v15  ;;  %v4078_v32 = vand.u32 4294901760, %v4050_v20  ;;  %v1121_v31 = vand.u32 4294901760, %v1120_v3 }
 0x10e   : > { %v4029_v7 = vadd.f32 %v892_v29, %v840_v24  ;;  %v1102_v48 = vsub.f32 %v4085_v57, %v4130_v38 }
 0x10f   : > { %v4120_v2 = vsub.f32 %v4050_v20, %v4078_v32 }
 0x110   : > { %v4044_v25 = vand.u32 4294901760, %v4029_v7 }
 0x111   : > { %v4152_v24 = vand.u32 4294901760, %v4120_v2 }
 0x112   : > { %v4070_v12 = vsub.f32 %v4029_v7, %v4044_v25 }
 0x113   : > { %v1108_v17 = vsub.f32 %v4120_v2, %v4152_v24 }
 0x114   : > { %v847_v13 = vpop.f32.mrf.mxu0  ;;  %v4112_v36 = vand.u32 4294901760, %v4070_v12 }
 0x115   : > { %v896_v18 = vpop.f32.mrf.mxu1  ;;  %v848_v40 = vadd.f32 %v847_v13, %v787_v19  ;;  %v1103_v13 = vand.u32 4294901760, %v1102_v48  ;;  %v1012_v19 = vand.u32 4294901760, %v1011_v52 }
 0x116   : > { %v4025_v26 = vadd.f32 %v896_v18, %v844_v23  ;;  %v4137_v23 = vand.u32 4294901760, %v964_v37  ;;  %v1096_v47 = vsub.f32 %v4070_v12, %v4112_v36 }
 0x118   : > { %v4038_v4 = vand.u32 4294901760, %v4025_v26  ;;  %v4165_v43 = vsub.f32 %v964_v37, %v4137_v23  ;;  %v1097_v16 = vand.u32 4294901760, %v1096_v47  ;;  %v1026_v37 = vand.u32 4294901760, %v4211_v30 }
 0x11a   : > { %v4057_v62 = vsub.f32 %v4025_v26, %v4038_v4  ;;  %v1018_v1 = vand.u32 4294901760, %v4165_v43 }
 0x11c   : > { %v4094_v11 = vand.u32 4294901760, %v4057_v62 }
 0x11d   : > { %v900_v27 = vpop.f32.mrf.mxu1 }
 0x11e   : > { %v4059_v5 = vadd.f32 %v900_v27, %v848_v40  ;;  %v1090_v22 = vsub.f32 %v4057_v62, %v4094_v11  ;;  %v1109_v40 = vand.u32 4294901760, %v1108_v17  ;;  %v1019_v27 = vsub.f32 %v4165_v43, %v1018_v1 }
 0x120   : > { %v4073_v29 = vand.u32 4294901760, %v4059_v5  ;;  %v1091_v45 = vand.u32 4294901760, %v1090_v22  ;;  %v1020_v53 = vand.u32 4294901760, %v1019_v27  ;;  %v1027_v22 = vsub.f32 %v4211_v30, %v1026_v37 }
 0x122   : > { %v4089_v6 = vsub.f32 %v4059_v5, %v4073_v29  ;;  %993 = vmatpush.msra.mxu2 %v4073_v29  ;;  %1244 = vmatpush.msra.mxu1 %v4073_v29  ;;  %v1028_v47 = vand.u32 4294901760, %v1027_v22 }
 0x124   : > { %995 = vmatpush.msra.mxu2 %v4038_v4  ;;  %1172 = vmatpush.msra.mxu0 %v4089_v6  ;;  %v4109_v10 = vand.u32 4294901760, %v4089_v6 }
 0x125   : > { %1246 = vmatpush.msra.mxu1 %v4038_v4 }
 0x126   : > { %997 = vmatpush.msra.mxu2 %v4044_v25  ;;  %1175 = vmatpush.msra.mxu0 %v4057_v62  ;;  %v1084_v15 = vsub.f32 %v4089_v6, %v4109_v10 }
 0x127   : > { %1248 = vmatpush.msra.mxu1 %v4044_v25 }
 0x128   : > { %999 = vmatpush.msra.mxu2 %v4053_v44  ;;  %1178 = vmatpush.msra.mxu0 %v4070_v12  ;;  %v1085_v18 = vand.u32 4294901760, %v1084_v15 }
 0x129   : > { %1250 = vmatpush.msra.mxu1 %v4053_v44 }
 0x12a   : > { %1001 = vmatpush.msra.mxu2 %v4078_v32  ;;  %1086 = vmatpush.msra.mxu3 %v1085_v18 }
 0x12b   : > { %1181 = vmatpush.msra.mxu0 %v4085_v57  ;;  %1252 = vmatpush.msra.mxu1 %v4078_v32 }
 0x12c   : > { %1003 = vmatpush.msra.mxu2 %v4104_v35  ;;  %1092 = vmatpush.msra.mxu3 %v1091_v45 }
 0x12d   : > { %1184 = vmatpush.msra.mxu0 %v4120_v2  ;;  %1254 = vmatpush.msra.mxu1 %v4104_v35 }
 0x12e   : > { %1005 = vmatpush.msra.mxu2 %v4134_v54  ;;  %1098 = vmatpush.msra.mxu3 %v1097_v16 }
 0x12f   : > { %1187 = vmatpush.msra.mxu0 %v4141_v51  ;;  %1256 = vmatpush.msra.mxu1 %v4134_v54 }
 0x130   : > { %1007 = vmatpush.msra.mxu2 %v4148_v59  ;;  %1104 = vmatpush.msra.mxu3 %v1103_v13 }
 0x131   : > { %1190 = vmatpush.msra.mxu0 %v4160_v55  ;;  %1258 = vmatpush.msra.mxu1 %v4148_v59 }
 0x132   : > { %1013 = vmatmul.f32.vlgmr.msra.gmra.mxu2 %v1012_v19  ;;  %1110 = vmatpush.msra.mxu3 %v1109_v40 }
 0x133   : > { %1518 = vmatpush.msrb.mxu1 %v1085_v18  ;;  %1319 = vmatpush.msrb.mxu2 %v4109_v10 }
 0x134   : > { %1193 = vmatpush.msra.mxu0 %v4176_v8  ;;  %1116 = vmatpush.msra.mxu3 %v1115_v42 }
 0x135   : > { %1524 = vmatpush.msrb.mxu1 %v1091_v45  ;;  %1196 = vmatmul.f32.vlgmr.msra.gmra.mxu0 %v4097_v61  ;;  %v906_v61 = vld [vmem:[%s4859_s3 + $0x18] sm:$0xff] }
 0x136   : > { %1323 = vmatpush.msrb.mxu2 %v4094_v11  ;;  %1481 = vmatpush.msrb.mxu0 %v4073_v29  ;;  %v970_v14 = vsel %vm959_vm1, %v906_v61, 0 }
 0x137   : > { %1262 = vmatmul.f32.vlgmr.msra.gmra.mxu1 %v1010_v39  ;;  %1122 = vmatpush.msra.mxu3 %v1121_v31  ;;  %v4226_v15 = vand.u32 4294901760, %v970_v14  ;;  %v907_v39 = vld [vmem:[%s4859_s3 + $0x20] sm:$0xff] }
 0x138   : > { %1327 = vmatpush.msrb.mxu2 %v4112_v36  ;;  %1483 = vmatpush.msrb.mxu0 %v4038_v4  ;;  %v973_v45 = vsel %vm959_vm1, %v907_v39, 0  ;;  %v932_v39 = vpop.permute.xlu2 %931 }
 0x139   : > { %1530 = vmatpush.msrb.mxu1 %v1097_v16  ;;  %1128 = vmatpush.msra.mxu3 %v1127_v33  ;;  %v1033_v18 = vsub.f32 %v970_v14, %v4226_v15  ;;  %v4245_v52 = vand.u32 4294901760, %v973_v45 }
 0x13a   : > { %1331 = vmatpush.msrb.mxu2 %v4130_v38  ;;  %1485 = vmatpush.msrb.mxu0 %v4044_v25 }
 0x13b   : > { %1536 = vmatpush.msrb.mxu1 %v1103_v13  ;;  %1021 = vmatmul.f32.gmra.mxu2 %v1020_v53  ;;  %v1034_v48 = vand.u32 4294901760, %v1033_v18  ;;  %v1041_v16 = vsub.f32 %v973_v45, %v4245_v52  ;;  %v1462_v13 = vld [vmem:[%s4861_s5] sm:$0xf]  ;;  %v922_v45 = vpop.permute.xlu1 %921 }
 0x13c   : > { %1130 = vmatmul.f32.vlgmr.msra.gmra.mxu3 %v4061_v28  ;;  %1335 = vmatpush.msrb.mxu2 %v4152_v24 }
 0x13d   : > { %1390 = vmatpush.msrb.mxu3 %v4073_v29  ;;  %1487 = vmatpush.msrb.mxu0 %v4053_v44 }
 0x13e   : > { %1542 = vmatpush.msrb.mxu1 %v1109_v40  ;;  %1201 = vmatmul.f32.gmra.mxu0 %v4165_v43  ;;  %v908_v43 = vld [vmem:[%s4859_s3 + $0x28] sm:$0xff] }
 0x13f   : > { %1339 = vmatpush.msrb.mxu2 %v4169_v49  ;;  %1392 = vmatpush.msrb.mxu3 %v4038_v4  ;;  %v976_v50 = vsel %vm959_vm1, %v908_v43, 0 }
 0x140   : > { %1489 = vmatpush.msrb.mxu0 %v4078_v32  ;;  %1548 = vmatpush.msrb.mxu1 %v1115_v42  ;;  %v4266_v17 = vand.u32 4294901760, %v976_v50 }
 0x141   : > { %1268 = vmatmul.f32.gmra.mxu1 %v1018_v1  ;;  %1343 = vmatpush.msrb.mxu2 %v4186_v46 }
 0x142   : > { %1394 = vmatpush.msrb.mxu3 %v4044_v25  ;;  %1491 = vmatpush.msrb.mxu0 %v4104_v35 }
 0x143   : > { %1554 = vmatpush.msrb.mxu1 %v1121_v31  ;;  %1347 = vmatpush.msrb.mxu2 %v4196_v60 }
 0x144   : > { %1396 = vmatpush.msrb.mxu3 %v4053_v44  ;;  %1493 = vmatpush.msrb.mxu0 %v4134_v54 }
 0x145   : > { %1560 = vmatpush.msrb.mxu1 %v1127_v33  ;;  %1576 = vmatpush.msra.mxu2 %v4089_v6  ;;  %v1035_v6 = vsub.f32 %v1033_v18, %v1034_v48 }
 0x146   : > { %1029 = vmatmul.f32.gmra.mxu2 %v1028_v47  ;;  %1134 = vmatmul.f32.gmra.mxu3 %v4137_v23 }
 0x147   : > { %1689 = vmatpush.msra.mxu1 %v4073_v29  ;;  %1495 = vmatpush.msrb.mxu0 %v4148_v59 }
 0x148   : > { %1398 = vmatpush.msrb.mxu3 %v4078_v32  ;;  %1579 = vmatpush.msra.mxu2 %v4057_v62  ;;  %v1036_v62 = vand.u32 4294901760, %v1035_v6 }
 0x149   : > { %1646 = vmatpush.msra.mxu0 %v4109_v10  ;;  %1691 = vmatpush.msra.mxu1 %v4038_v4  ;;  %v1042_v10 = vand.u32 4294901760, %v1041_v16 }
 0x14a   : > { %1206 = vmatmul.f32.gmra.mxu0 %v4211_v30  ;;  %1400 = vmatpush.msrb.mxu3 %v4104_v35 }
 0x14b   : > { %1582 = vmatpush.msra.mxu2 %v4070_v12  ;;  %1650 = vmatpush.msra.mxu0 %v4094_v11  ;;  %v909_v12 = vld [vmem:[%s4859_s3 + $0x30] sm:$0xff]  ;;  %v1049_v11 = vsub.f32 %v976_v50, %v4266_v17  ;;  %v927_v50 = vpop.permute.xlu2 %926 }
 0x14c   : > { %1693 = vmatpush.msra.mxu1 %v4044_v25  ;;  %1402 = vmatpush.msrb.mxu3 %v4134_v54 }
 0x14d   : > { %1274 = vmatmul.f32.gmra.mxu1 %v1026_v37  ;;  %1585 = vmatpush.msra.mxu2 %v4085_v57  ;;  %v1043_v57 = vsub.f32 %v1041_v16, %v1042_v10 }
 0x14e   : > { %1654 = vmatpush.msra.mxu0 %v4112_v36  ;;  %1695 = vmatpush.msra.mxu1 %v4053_v44  ;;  %v979_v36 = vsel %vm959_vm1, %v909_v12, 0 }
 0x14f   : > { %1404 = vmatpush.msrb.mxu3 %v4148_v59  ;;  %1588 = vmatpush.msra.mxu2 %v4120_v2  ;;  %v1050_v2 = vand.u32 4294901760, %v1049_v11 }
 0x150   : > { %1658 = vmatpush.msra.mxu0 %v4130_v38  ;;  %1697 = vmatpush.msra.mxu1 %v4078_v32  ;;  %v4287_v38 = vand.u32 4294901760, %v979_v36 }
 0x151   : > { %1613 = vmatpush.msra.mxu3 %v4073_v29  ;;  %1037 = vmatmul.f32.gmra.mxu2 %v1036_v62  ;;  %v1044_v29 = vand.u32 4294901760, %v1043_v57 }
 0x152   : > { %1138 = vmatmul.f32.gmra.mxu3 %v4198_v63  ;;  %1591 = vmatpush.msra.mxu2 %v4141_v51  ;;  %v1057_v51 = vsub.f32 %v979_v36, %v4287_v38 }
 0x153   : > { %1615 = vmatpush.msra.mxu3 %v4038_v4  ;;  %1662 = vmatpush.msra.mxu0 %v4152_v24  ;;  %v910_v4 = vld [vmem:[%s4859_s3 + $0x38] sm:$0xff] }
 0x154   : > { %1699 = vmatpush.msra.mxu1 %v4104_v35  ;;  %1211 = vmatmul.f32.gmra.mxu0 %v1033_v18  ;;  %v982_v24 = vsel %vm959_vm1, %v910_v4, 0 }
 0x155   : > { %1594 = vmatpush.msra.mxu2 %v4160_v55  ;;  %1617 = vmatpush.msra.mxu3 %v4044_v25  ;;  %v1051_v25 = vsub.f32 %v1049_v11, %v1050_v2  ;;  %v1058_v55 = vand.u32 4294901760, %v1057_v51 }
 0x156   : > { %1666 = vmatpush.msra.mxu0 %v4169_v49  ;;  %1701 = vmatpush.msra.mxu1 %v4134_v54  ;;  %v1064_v49 = vand.u32 4294901760, %v982_v24 }
 0x157   : > { %1280 = vmatmul.f32.gmra.mxu1 %v1034_v48  ;;  %1597 = vmatpush.msra.mxu2 %v4176_v8  ;;  %v1059_v8 = vsub.f32 %v1057_v51, %v1058_v55 }
 0x158   : > { %1619 = vmatpush.msra.mxu3 %v4053_v44  ;;  %1670 = vmatpush.msra.mxu0 %v4186_v46  ;;  %v1052_v44 = vand.u32 4294901760, %v1051_v25  ;;  %v1470_v46 = vsel %vm959_vm1, %v1462_v13, 0  ;;  %v4346_v25 = vld [vmem:[%s4863_s7] ss:$0 sm:$0xff] }
 0x159   : > { %1703 = vmatpush.msra.mxu1 %v4148_v59  ;;  %1045 = vmatmul.f32.gmra.mxu2 %v1044_v29  ;;  %v1496_v1 = vand.u32 4294901760, %v1470_v46  ;;  %v4352_v13 = vld [vmem:[%s4864_s8] ss:$0 sm:$0xff] }
 0x15a   : > { %1621 = vmatpush.msra.mxu3 %v4078_v32  ;;  %1674 = vmatpush.msra.mxu0 %v4196_v60  ;;  %v1065_v32 = vsub.f32 %v982_v24, %v1064_v49 }
 0x15b   : > { %1142 = vmatmul.f32.gmra.mxu3 %v4226_v15 }
 0x15c   : > { %1623 = vmatpush.msra.mxu3 %v4104_v35  ;;  %1216 = vmatmul.f32.gmra.mxu0 %v1041_v16  ;;  %v1060_v35 = vand.u32 4294901760, %v1059_v8  ;;  %v1066_v19 = vand.u32 4294901760, %v1065_v32 }
 0x15e   : > { %1625 = vmatpush.msra.mxu3 %v4134_v54  ;;  %v1067_v54 = vsub.f32 %v1065_v32, %v1066_v19 }
 0x15f   : > { %1286 = vmatmul.f32.gmra.mxu1 %v1042_v10 }
 0x160   : > { %1627 = vmatpush.msra.mxu3 %v4148_v59  ;;  %v1497_v59 = vsub.f32 %v1470_v46, %v1496_v1  ;;  %v1068_v9 = vand.u32 4294901760, %v1067_v54 }
 0x161   : > { %1053 = vmatmul.f32.gmra.mxu2 %v1052_v44 }
 0x162   : > { %v1498_v21 = vand.u32 4294901760, %v1497_v59 }
 0x163   : > { %1146 = vmatmul.f32.gmra.mxu3 %v4245_v52 }
 0x164   : > { %1221 = vmatmul.f32.gmra.mxu0 %v1049_v11  ;;  %v1499_v40 = vsub.f32 %v1497_v59, %v1498_v21 }
 0x166   : > { %v1500_v60 = vand.u32 4294901760, %v1499_v40 }
 0x167   : > { %1292 = vmatmul.f32.gmra.mxu1 %v1050_v2 }
 0x169   : > { %1061 = vmatmul.f32.gmra.mxu2 %v1060_v35 }
 0x16b   : > { %1150 = vmatmul.f32.gmra.mxu3 %v4266_v17 }
 0x16c   : > { %1226 = vmatmul.f32.gmra.mxu0 %v1057_v51 }
 0x16f   : > { %1298 = vmatmul.f32.gmra.mxu1 %v1058_v55 }
 0x171   : > { %1069 = vmatmul.f32.gmra.mxu2 %v1068_v9 }
 0x173   : > { %1154 = vmatmul.f32.gmra.mxu3 %v4287_v38 }
 0x174   : > { %1231 = vmatmul.f32.gmra.mxu0 %v1065_v32 }
 0x177   : > { %1304 = vmatmul.f32.gmra.mxu1 %v1066_v19 }
 0x179   : > { %1349 = vmatmul.f32.vlgmr.msrb.gmra.mxu2 %v4061_v28 }
 0x17b   : > { %1158 = vmatmul.f32.gmra.mxu3 %v1064_v49 }
 0x17c   : > { %1501 = vmatmul.f32.vlgmr.msrb.gmra.mxu0 %v1500_v60 }
 0x17f   : > { %1562 = vmatmul.f32.vlgmr.msrb.gmra.mxu1 %v1496_v1 }
 0x181   : > { %1353 = vmatmul.f32.gmra.mxu2 %v4137_v23 }
 0x183   : > { %1406 = vmatmul.f32.vlgmr.msrb.gmra.mxu3 %v4061_v28 }
 0x184   : > { %1676 = vmatmul.f32.vlgmr.msra.gmra.mxu0 %v1496_v1 }
 0x187   : > { %1705 = vmatmul.f32.vlgmr.msra.gmra.mxu1 %v1496_v1  ;;  %v937_v1 = vpop.permute.xlu0 %936 }
 0x189   : > { %1357 = vmatmul.f32.gmra.mxu2 %v4198_v63 }
 0x18b   : > { %1410 = vmatmul.f32.gmra.mxu3 %v4137_v23 }
 0x191   : > { %1361 = vmatmul.f32.gmra.mxu2 %v4226_v15 }
 0x193   : > { %1414 = vmatmul.f32.gmra.mxu3 %v4198_v63 }
 0x199   : > { %1365 = vmatmul.f32.gmra.mxu2 %v4245_v52 }
 0x19b   : > { %1418 = vmatmul.f32.gmra.mxu3 %v4226_v15 }
 0x1a1   : > { %1369 = vmatmul.f32.gmra.mxu2 %v4266_v17 }
 0x1a3   : > { %1422 = vmatmul.f32.gmra.mxu3 %v4245_v52 }
 0x1a9   : > { %1373 = vmatmul.f32.gmra.mxu2 %v4287_v38 }
 0x1ab   : > { %1426 = vmatmul.f32.gmra.mxu3 %v4266_v17 }
 0x1b1   : > { %1377 = vmatmul.f32.gmra.mxu2 %v1064_v49 }
 0x1b2   : > { %v1197_v33 = vpop.f32.mrf.mxu0 }
 0x1b3   : > { %1430 = vmatmul.f32.gmra.mxu3 %v4287_v38 }
 0x1b4   : > { %v1263_v15 = vpop.f32.mrf.mxu1 }
 0x1b5   : > { %v1014_v28 = vpop.f32.mrf.mxu2 }
 0x1b6   : > { %v1015_v52 = vadd.f32 %v1014_v28, %v922_v45 }
 0x1b9   : > { %1600 = vmatmul.f32.vlgmr.msra.gmra.mxu2 %v1497_v59 }
 0x1bb   : > { %1434 = vmatmul.f32.gmra.mxu3 %v1064_v49  ;;  %v1202_v18 = vpop.f32.mrf.mxu0 }
 0x1be   : > { %v1022_v23 = vpop.f32.mrf.mxu2  ;;  %v1269_v48 = vpop.f32.mrf.mxu1 }
 0x1bf   : > { %v1131_v63 = vpop.f32.mrf.mxu3  ;;  %v1023_v10 = vadd.f32 %v1022_v23, %v927_v50 }
 0x1c0   : > { %v1132_v6 = vadd.f32 %v1131_v63, %v1015_v52 }
 0x1c2   : > { %v1198_v17 = vadd.f32 %v1197_v33, %v1132_v6 }
 0x1c3   : > { %1631 = vmatmul.f32.vlgmr.msra.gmra.mxu3 %v1498_v21 }
 0x1c4   : > { %v1264_v36 = vadd.f32 %v1263_v15, %v1198_v17 }
 0x1c7   : > { %v1207_v62 = vpop.f32.mrf.mxu0 }
 0x1c9   : > { %v1030_v3 = vpop.f32.mrf.mxu2  ;;  %v1135_v27 = vpop.f32.mrf.mxu3 }
 0x1ca   : > { %v1136_v12 = vadd.f32 %v1135_v27, %v1023_v10  ;;  %v1275_v57 = vpop.f32.mrf.mxu1  ;;  %v1031_v24 = vadd.f32 %v1030_v3, %v932_v39 }
 0x1cc   : > { %v1203_v2 = vadd.f32 %v1202_v18, %v1136_v12 }
 0x1ce   : > { %v1270_v44 = vadd.f32 %v1269_v48, %v1203_v2  ;;  %v942_v48 = vpop.permute.xlu1 %941  ;;  %v947_v2 = vpop.permute.xlu2 %946 }
 0x1d1   : > { %v1212_v51 = vpop.f32.mrf.mxu0 }
 0x1d4   : > { %v1038_v42 = vpop.f32.mrf.mxu2  ;;  %v1281_v35 = vpop.f32.mrf.mxu1 }
 0x1d5   : > { %v1139_v56 = vpop.f32.mrf.mxu3  ;;  %v1039_v54 = vadd.f32 %v1038_v42, %v937_v1 }
 0x1d6   : > { %v1140_v49 = vadd.f32 %v1139_v56, %v1031_v24 }
 0x1d8   : > { %v1208_v59 = vadd.f32 %v1207_v62, %v1140_v49  ;;  %v4360_v62 = vpop.permute.xlu0 %1466 }
 0x1d9   : > { %v1217_v28 = vpop.f32.mrf.mxu0 }
 0x1da   : > { %v1276_v3 = vadd.f32 %v1275_v57, %v1208_v59 }
 0x1dc   : > { %v4327_v30 = vpop.f32.mrf.mxu2  ;;  %v1287_v39 = vpop.f32.mrf.mxu1 }
 0x1de   : > { %v1143_v31 = vpop.f32.mrf.mxu3 }
 0x1df   : > { %v1144_v40 = vadd.f32 %v1143_v31, %v1039_v54  ;;  %v1047_v31 = vadd.f32 %v4327_v30, %v942_v48 }
 0x1e1   : > { %v1213_v15 = vadd.f32 %v1212_v51, %v1144_v40  ;;  %v1222_v57 = vpop.f32.mrf.mxu0 }
 0x1e4   : > { %v4329_v53 = vpop.f32.mrf.mxu2 }
 0x1e6   : > { %v4331_v61 = vpop.f32.mrf.mxu3 }
 0x1e7   : > { %v1148_v10 = vadd.f32 %v4331_v61, %v1047_v31 }
 0x1e9   : > { %v1218_v51 = vadd.f32 %v1217_v28, %v1148_v10  ;;  %v957_v10 = vpop.permute.xlu1 %956 }
 0x1ec   : > { %v4333_v37 = vpop.f32.mrf.mxu2 }
 0x1ee   : > { %v4335_v14 = vpop.f32.mrf.mxu3 }
 0x1f4   : > { %v4337_v22 = vpop.f32.mrf.mxu2 }
 0x1f6   : > { %v4339_v47 = vpop.f32.mrf.mxu3 }
 0x1fc   : > { %v1350_v43 = vpop.f32.mrf.mxu2 }
 0x1fd   : > { %v1351_v38 = vadd.f32 %v1350_v43, %v1264_v36  ;;  %v1282_v43 = vadd.f32 %v1281_v35, %v1213_v15 }
 0x1fe   : > { %v4341_v16 = vpop.f32.mrf.mxu3 }
 0x204   : > { %v1354_v11 = vpop.f32.mrf.mxu2 }
 0x205   : > { %v1355_v8 = vadd.f32 %v1354_v11, %v1270_v44  ;;  %v1293_v44 = vpop.f32.mrf.mxu1 }
 0x206   : > { %v1407_v29 = vpop.f32.mrf.mxu3 }
 0x207   : > { %v1408_v4 = vadd.f32 %v1407_v29, %v1351_v38 }
 0x209   : > { %v1442_v32 = vmul.f32 %v4346_v25, %v1408_v4  ;;  %v1055_v4 = vadd.f32 %v4329_v53, %v947_v2 }
 0x20b   : > { %v1454_v9 = vadd.f32 %v4352_v13, %v1442_v32  ;;  %v1152_v61 = vadd.f32 %v4335_v14, %v1055_v4 }
 0x20c   : > { %v1358_v55 = vpop.f32.mrf.mxu2 }
 0x20d   : > { %v1729_v63 = vsel %vm1728_vm2, %v1454_v9, -inf  ;;  %v1359_v42 = vadd.f32 %v1358_v55, %v1276_v3  ;;  %v1223_v40 = vadd.f32 %v1222_v57, %v1152_v61 }
 0x20e   : > { %v1411_v19 = vpop.f32.mrf.mxu3 }
 0x20f   : > { %v1412_v46 = vadd.f32 %v1411_v19, %v1355_v8 }
 0x211   : > { %v1443_v21 = vmul.f32 %v4346_v25, %v1412_v46  ;;  %v1288_v46 = vadd.f32 %v1287_v39, %v1218_v51 }
 0x213   : > { %v1455_v60 = vadd.f32 %v4352_v13, %v1443_v21 }
 0x214   : > { %v1362_v23 = vpop.f32.mrf.mxu2 }
 0x215   : > { %v1730_v27 = vsel %vm1728_vm2, %v1455_v60, -inf  ;;  %v1363_v17 = vadd.f32 %v1362_v23, %v1282_v43  ;;  %v952_v23 = vpop.permute.xlu0 %951 }
 0x216   : > { %v1731_v56 = vmax.f32 %v1729_v63, %v1730_v27  ;;  %v1415_v33 = vpop.f32.mrf.mxu3  ;;  %v1227_v63 = vpop.f32.mrf.mxu0  ;;  %v1063_v3 = vadd.f32 %v4333_v37, %v952_v23 }
 0x217   : > { %v1416_v45 = vadd.f32 %v1415_v33, %v1359_v42  ;;  %v1299_v33 = vpop.f32.mrf.mxu1 }
 0x218   : > { %v1732_v18 = vrot.slane %v1731_v56, 4  ;;  %v1156_v27 = vadd.f32 %v4339_v47, %v1063_v3 }
 0x219   : > { %v1444_v12 = vmul.f32 %v4346_v25, %v1416_v45 }
 0x21a   : > { %v1733_v52 = vmax.f32 %v1731_v56, %v1732_v18  ;;  %v1294_v56 = vadd.f32 %v1293_v44, %v1223_v40  ;;  %v1228_v43 = vadd.f32 %v1227_v63, %v1156_v27 }
 0x21b   : > { %v1456_v30 = vadd.f32 %v4352_v13, %v1444_v12 }
 0x21c   : > { %v1734_v6 = vrot.slane %v1733_v52, 2  ;;  %v1366_v50 = vpop.f32.mrf.mxu2  ;;  %v1300_v2 = vadd.f32 %v1299_v33, %v1228_v43 }
 0x21d   : > { %v1772_v19 = vsel %vm1728_vm2, %v1456_v30, -inf  ;;  %v1367_v28 = vadd.f32 %v1366_v50, %v1288_v46 }
 0x21e   : > { %v1735_v11 = vmax.f32 %v1733_v52, %v1734_v6  ;;  %v1419_v36 = vpop.f32.mrf.mxu3  ;;  %v1232_v57 = vpop.f32.mrf.mxu0 }
 0x21f   : > { %v1420_v29 = vadd.f32 %v1419_v36, %v1363_v17 }
 0x220   : > { %v1736_v38 = vrot.slane %v1735_v11, 1 }
 0x221   : > { %v1445_v24 = vmul.f32 %v4346_v25, %v1420_v29 }
 0x222   : > { %v1737_v55 = vmax.f32 %v1735_v11, %v1736_v38  ;;  %v1071_v11 = vadd.f32 %v4337_v22, %v957_v10 }
 0x223   : > { %v1457_v49 = vadd.f32 %v4352_v13, %v1445_v24 }
 0x224   : > { %v1738_v8 = vsub.f32 %v1454_v9, %v1737_v55  ;;  %v1739_v32 = vsub.f32 %v1455_v60, %v1737_v55  ;;  %v1370_v35 = vpop.f32.mrf.mxu2  ;;  %v1160_v4 = vadd.f32 %v4341_v16, %v1071_v11 }
 0x225   : > { %v1773_v1 = vsel %vm1728_vm2, %v1457_v49, -inf  ;;  %v1371_v42 = vadd.f32 %v1370_v35, %v1294_v56 }
 0x226   : > { %v1740_v53 = vmul.f32 1.442695, %v1738_v8  ;;  %v1742_v54 = vmul.f32 1.442695, %v1739_v32  ;;  %v1774_v59 = vmax.f32 %v1772_v19, %v1773_v1  ;;  %v1423_v21 = vpop.f32.mrf.mxu3  ;;  %v1305_v8 = vpop.f32.mrf.mxu1 }
 0x227   : > { %v1424_v9 = vadd.f32 %v1423_v21, %v1367_v28  ;;  %v1502_v40 = vpop.f32.mrf.mxu0 }
 0x228   : > { %3571 = vpow2.f32 %v1740_v53  ;;  %v1775_v14 = vrot.slane %v1774_v59, 4  ;;  %v1233_v53 = vadd.f32 %v1232_v57, %v1160_v4  ;;  %v1503_v56 = vadd.f32 %v1502_v40, %v4360_v62 }
 0x229   : > { %3573 = vpow2.f32 %v1742_v54  ;;  %v1446_v39 = vmul.f32 %v4346_v25, %v1424_v9 }
 0x22a   : > { %v1776_v60 = vmax.f32 %v1774_v59, %v1775_v14  ;;  %v1306_v23 = vadd.f32 %v1305_v8, %v1233_v53 }
 0x22b   : > { %v1458_v17 = vadd.f32 %v4352_v13, %v1446_v39 }
 0x22c   : > { %v1777_v15 = vrot.slane %v1776_v60, 2  ;;  %v1374_v48 = vpop.f32.mrf.mxu2 }
 0x22d   : > { %v2540_v44 = vsel %vm1728_vm2, %v1458_v17, -inf  ;;  %v1375_v55 = vadd.f32 %v1374_v48, %v1300_v2 }
 0x22e   : > { %v4374_v18 = vpop.eup %3571  ;;  %v1778_v45 = vmax.f32 %v1776_v60, %v1777_v15  ;;  %v1427_v52 = vpop.f32.mrf.mxu3 }
 0x22f   : > { %v4376_v31 = vpop.eup %3573  ;;  %v1744_v37 = vsel %vm1728_vm2, %v4374_v18, 0.0  ;;  %v1428_v6 = vadd.f32 %v1427_v52, %v1371_v42  ;;  %v1563_v33 = vpop.f32.mrf.mxu1 }
 0x230   : > { %v1745_v47 = vsel %vm1728_vm2, %v4376_v31, 0.0  ;;  %v1779_v50 = vrot.slane %v1778_v45, 1 }
 0x231   : > { %v1447_v12 = vmul.f32 %v4346_v25, %v1428_v6  ;;  %v1746_v36 = vadd.f32 %v1745_v47, %v1744_v37  ;;  %v1564_v47 = vadd.f32 %v1563_v33, %v1503_v56 }
 0x232   : > { %v1780_v29 = vmax.f32 %v1778_v45, %v1779_v50 }
 0x233   : > { %v1459_v38 = vadd.f32 %v4352_v13, %v1447_v12  ;;  %v1747_v32 = vrot.slane %v1746_v36, 4 }
 0x234   : > { %v1781_v51 = vsub.f32 %v1456_v30, %v1780_v29  ;;  %v1782_v24 = vsub.f32 %v1457_v49, %v1780_v29  ;;  %v1378_v59 = vpop.f32.mrf.mxu2 }
 0x235   : > { %v2541_v61 = vsel %vm1728_vm2, %v1459_v38, -inf  ;;  %v1748_v30 = vadd.f32 %v1747_v32, %v1746_v36  ;;  %v1379_v9 = vadd.f32 %v1378_v59, %v1306_v23 }
 0x236   : > { %v1783_v35 = vmul.f32 1.442695, %v1781_v51  ;;  %v1785_v19 = vmul.f32 1.442695, %v1782_v24  ;;  %v2542_v46 = vmax.f32 %v2540_v44, %v2541_v61  ;;  %v1431_v22 = vpop.f32.mrf.mxu3  ;;  %v1677_v51 = vpop.f32.mrf.mxu0 }
 0x237   : > { %v1432_v1 = vadd.f32 %v1431_v22, %v1375_v55  ;;  %v1749_v14 = vrot.slane %v1748_v30, 2 }
 0x238   : > { %3575 = vpow2.f32 %v1783_v35  ;;  %v2543_v54 = vrot.slane %v2542_v46, 4 }
 0x239   : > { %3577 = vpow2.f32 %v1785_v19  ;;  %v1448_v16 = vmul.f32 %v4346_v25, %v1432_v1  ;;  %v1750_v52 = vadd.f32 %v1749_v14, %v1748_v30 }
 0x23a   : > { %v2544_v49 = vmax.f32 %v2542_v46, %v2543_v54 }
 0x23b   : > { %v4391_v21 = vadd.f32 %v4352_v13, %v1448_v16  ;;  %v1751_v36 = vrot.slane %v1750_v52, 1 }
 0x23c   : > { %v2545_v28 = vrot.slane %v2544_v49, 2  ;;  %v1601_v6 = vpop.f32.mrf.mxu2 }
 0x23d   : > { %v1602_v11 = vadd.f32 %v1601_v6, %v1564_v47  ;;  %v2947_v44 = vsel %vm1728_vm2, %v4391_v21, -inf  ;;  %v4407_v8 = vadd.f32 %v1751_v36, %v1750_v52 }
 0x23e   : > { %v4393_v63 = vpop.eup %3575  ;;  %v2546_v3 = vmax.f32 %v2544_v49, %v2545_v28  ;;  %v1435_v60 = vpop.f32.mrf.mxu3 }
 0x23f   : > { %v4395_v27 = vpop.eup %3577  ;;  %v1787_v15 = vsel %vm1728_vm2, %v4393_v63, 0.0  ;;  %v1436_v45 = vadd.f32 %v1435_v60, %v1379_v9  ;;  %vm1758_vm4 = vweird.f32 %v4407_v8 }
 0x240   : > { %v1788_v42 = vsel %vm1728_vm2, %v4395_v27, 0.0  ;;  %v2547_v39 = vrot.slane %v2546_v3, 1 }
 0x241   : > { %v1789_v48 = vadd.f32 %v1788_v42, %v1787_v15  ;;  %v1449_v37 = vmul.f32 %v4346_v25, %v1436_v45 }
 0x242   : > { %v2548_v43 = vmax.f32 %v2546_v3, %v2547_v39 }
 0x243   : > { %v1790_v50 = vrot.slane %v1789_v48, 4  ;;  %v1461_v62 = vadd.f32 %v4352_v13, %v1449_v37 }
 0x244   : > { %v2549_v10 = vsub.f32 %v1458_v17, %v2548_v43  ;;  %v2550_v12 = vsub.f32 %v1459_v38, %v2548_v43  ;;  %v1706_v17 = vpop.f32.mrf.mxu1 }
 0x245   : > { %v1791_v57 = vadd.f32 %v1790_v50, %v1789_v48  ;;  %v2948_v25 = vsel %vm1728_vm2, %v1461_v62, -inf }
 0x246   : > { %v2551_v29 = vmul.f32 1.442695, %v2549_v10  ;;  %v2553_v2 = vmul.f32 1.442695, %v2550_v12  ;;  %v1632_v4 = vpop.f32.mrf.mxu3  ;;  %v2949_v61 = vmax.f32 %v2947_v44, %v2948_v25  ;;  %v1764_v25 = vand.u32 2147483648, %v4407_v8 }
 0x247   : > { %v1792_v24 = vrot.slane %v1791_v57, 2  ;;  %v1633_v55 = vadd.f32 %v1632_v4, %v1602_v11 }
 0x248   : > { %3579 = vpow2.f32 %v2551_v29  ;;  %v2950_v32 = vrot.slane %v2949_v61, 4 }
 0x249   : > { %v1793_v38 = vadd.f32 %v1792_v24, %v1791_v57  ;;  %3581 = vpow2.f32 %v2553_v2  ;;  %v1678_v13 = vadd.f32 %v1677_v51, %v1633_v55  ;;  %v1762_v51 = vand.u32 2147483647, %v4407_v8 }
 0x24a   : > { %v2951_v46 = vmax.f32 %v2949_v61, %v2950_v32  ;;  %3583 = vrcp.f32 %v4407_v8  ;;  %v2149_v61 = vsel %vm1728_vm2, %v4066_v0, 0 }
 0x24b   : > { %v1794_v35 = vrot.slane %v1793_v38, 1  ;;  %v1707_v19 = vadd.f32 %v1706_v17, %v1678_v13  ;;  %vm1763_vm10 = vcmp.eq.f32.partialorder %v1762_v51, 8.507059e+37 }
 0x24c   : > { %v2952_v54 = vrot.slane %v2951_v46, 2 }
 0x24d   : > { %v4409_v22 = vadd.f32 %v1794_v35, %v1793_v38  ;;  %v1709_v1 = vsub.f32 0.0, %v1707_v19 }
 0x24e   : > { %v4411_v53 = vpop.eup %3579  ;;  %v2953_v49 = vmax.f32 %v2951_v46, %v2952_v54 }
 0x24f   : > { %v4414_v59 = vpop.eup %3581  ;;  %3585 = vrcp.f32 %v4409_v22  ;;  %v2555_v16 = vsel %vm1728_vm2, %v4411_v53, 0.0  ;;  %v1710_v40 = vmul.f32 1.442695, %v1709_v1  ;;  %v1807_v17 = vand.u32 2147483648, %v4409_v22 }
 0x250   : > { %v2556_v30 = vsel %vm1728_vm2, %v4414_v59, 0.0  ;;  %v2954_v23 = vrot.slane %v2953_v49, 1  ;;  %v4421_v14 = vpop.eup %3583  ;;  %vm1801_vm7 = vweird.f32 %v4409_v22 }
 0x251   : > { %v2557_v28 = vadd.f32 %v2556_v30, %v2555_v16  ;;  %3587 = vpow2.f32 %v1710_v40  ;;  %v1754_v33 = vmul.f32 %v4421_v14, %v4407_v8  ;;  %vm1759_vm3 = vweird.f32 %v4421_v14 }
 0x252   : > { %v2955_v9 = vmax.f32 %v2953_v49, %v2954_v23  ;;  %vm4450_vm6 = vmor %vm1758_vm4, %vm1759_vm3  ;;  %v1805_v8 = vand.u32 2147483647, %v4409_v22  ;;  %v4878_v16 = vmov 0   ;;  %v1765_v49 = vor.u32 1.1754944e-38, %v1764_v25 }
 0x253   : > { %v2558_v3 = vrot.slane %v2557_v28, 4  ;;  %v1755_v47 = vsub.f32 1.0, %v1754_v33  ;;  %v1816_v30 = vsel %vm1728_vm2, 1.0, %v4878_v16 }
 0x254   : > { %v2956_v15 = vsub.f32 %v4391_v21, %v2955_v9  ;;  %v2957_v42 = vsub.f32 %v1461_v62, %v2955_v9  ;;  %vm1806_vm12 = vcmp.eq.f32.partialorder %v1805_v8, 8.507059e+37 }
 0x255   : > { %v4423_v60 = vpop.eup %3585  ;;  %v2559_v56 = vadd.f32 %v2558_v3, %v2557_v28  ;;  %v1756_v12 = vmul.f32 %v4421_v14, %v1755_v47  ;;  %v1808_v28 = vor.u32 1.1754944e-38, %v1807_v17 }
 0x256   : > { %v1797_v48 = vmul.f32 %v4423_v60, %v4409_v22  ;;  %v2958_v52 = vmul.f32 1.442695, %v2956_v15  ;;  %v2960_v43 = vmul.f32 1.442695, %v2957_v42  ;;  %vm1802_vm5 = vweird.f32 %v4423_v60 }
 0x257   : > { %v2560_v39 = vrot.slane %v2559_v56, 2  ;;  %v3588_v45 = vpop.eup %3587  ;;  %v1757_v2 = vadd.f32 %v4421_v14, %v1756_v12  ;;  %vm4460_vm8 = vmor %vm1801_vm7, %vm1802_vm5  ;;  %v4471_v42 = vsub.f32 %v1816_v30, %v1816_v30 }
 0x258   : > { %v1712_v6 = vadd.f32 1.0, %v3588_v45  ;;  %3589 = vpow2.f32 %v2958_v52  ;;  %v1798_v50 = vsub.f32 1.0, %v1797_v48 }
 0x259   : > { %v2561_v37 = vadd.f32 %v2560_v39, %v2559_v56  ;;  %3591 = vpow2.f32 %v2960_v43  ;;  %v1761_v32 = vsel %vm4450_vm6, %v4421_v14, %v1757_v2 }
 0x25a   : > { %3593 = vrcp.f32 %v1712_v6  ;;  %v1799_v21 = vmul.f32 %v4423_v60, %v1798_v50  ;;  %v1724_v35 = vand.u32 2147483648, %v1712_v6  ;;  %v1722_v54 = vand.u32 2147483647, %v1712_v6 }
 0x25b   : > { %v2562_v10 = vrot.slane %v2561_v37, 1  ;;  %vm1718_vm11 = vweird.f32 %v1712_v6  ;;  %v1766_v3 = vsel %vm1763_vm10, %v1765_v49, %v1761_v32 }
 0x25c   : > { %v1800_v55 = vadd.f32 %v4423_v60, %v1799_v21  ;;  %v1725_v9 = vor.u32 1.1754944e-38, %v1724_v35  ;;  %vm1723_vm14 = vcmp.eq.f32.partialorder %v1722_v54, 8.507059e+37  ;;  %v1768_v43 = vmul.f32 %v4376_v31, %v1766_v3 }
 0x25d   : > { %v4434_v62 = vadd.f32 %v2562_v10, %v2561_v37  ;;  %v4485_v21 = vand.u32 4294901760, %v4471_v42 }
 0x25e   : > { %v4431_v57 = vpop.eup %3589  ;;  %v1804_v40 = vsel %vm4460_vm8, %v4423_v60, %v1800_v55 }
 0x25f   : > { %v4436_v11 = vpop.eup %3591  ;;  %v2962_v36 = vsel %vm1728_vm2, %v4431_v57, 0.0  ;;  %3595 = vrcp.f32 %v4434_v62  ;;  %v1809_v56 = vsel %vm1806_vm12, %v1808_v28, %v1804_v40  ;;  %vm2569_vm15 = vweird.f32 %v4434_v62 }
 0x260   : > { %v3594_v29 = vpop.eup %3593  ;;  %v2963_v4 = vsel %vm1728_vm2, %v4436_v11, 0.0  ;;  %v1810_v37 = vmul.f32 %v4393_v63, %v1809_v56 }
 0x261   : > { %v2964_v24 = vadd.f32 %v2963_v4, %v2962_v36  ;;  %v1714_v44 = vmul.f32 %v3594_v29, %v1712_v6  ;;  %vm1719_vm9 = vweird.f32 %v3594_v29  ;;  %v1811_v6 = vmul.f32 %v4395_v27, %v1809_v56 }
 0x262   : > { %vm1720_vm13 = vmor %vm1718_vm11, %vm1719_vm9 }
 0x263   : > { %v2965_v38 = vrot.slane %v2964_v24, 4  ;;  %v1715_v13 = vsub.f32 1.0, %v1714_v44 }
 0x265   : > { %v2966_v46 = vadd.f32 %v2965_v38, %v2964_v24  ;;  %v1716_v1 = vmul.f32 %v3594_v29, %v1715_v13  ;;  %v4469_v14 = vpop.eup %3595  ;;  %v1845_v24 = vsub.f32 %v4471_v42, %v4485_v21 }
 0x266   : > { %v2565_v60 = vmul.f32 %v4469_v14, %v4434_v62  ;;  %vm2570_vm0 = vweird.f32 %v4469_v14 }
 0x267   : > { %v2967_v22 = vrot.slane %v2966_v46, 2  ;;  %v1717_v23 = vadd.f32 %v3594_v29, %v1716_v1  ;;  %v4518_v8 = vand.u32 4294901760, %v1845_v24  ;;  %v2575_v1 = vand.u32 2147483648, %v4434_v62  ;;  %vm4545_vm1 = vmor %vm2569_vm15, %vm2570_vm0 }
 0x268   : > { %v2566_v36 = vsub.f32 1.0, %v2565_v60 }
 0x269   : > { %v2968_v33 = vadd.f32 %v2967_v22, %v2966_v46  ;;  %v1721_v15 = vsel %vm1720_vm13, %v3594_v29, %v1717_v23  ;;  %v1767_v29 = vmul.f32 %v4374_v18, %v1766_v3  ;;  %v2573_v46 = vand.u32 2147483647, %v4434_v62 }
 0x26a   : > { %v4473_v39 = vsel %vm1723_vm14, %v1725_v9, %v1721_v15  ;;  %v2567_v44 = vmul.f32 %v4469_v14, %v2566_v36  ;;  %v4551_v9 = vand.u32 4294901760, %v2149_v61  ;;  %v2576_v62 = vor.u32 1.1754944e-38, %v2575_v1 }
 0x26b   : > { %v2969_v45 = vrot.slane %v2968_v33, 1  ;;  %v1769_v48 = vperm.slane %v4473_v39, 0  ;;  %v1812_v52 = vperm.slane %v4473_v39, 1  ;;  %vm2574_vm4 = vcmp.eq.f32.partialorder %v2573_v46, 8.507059e+37 }
 0x26c   : > { %v2568_v19 = vadd.f32 %v4469_v14, %v2567_v44 }
 0x26d   : > { %v4482_v47 = vadd.f32 %v2969_v45, %v2968_v33  ;;  %v1771_v50 = vmul.f32 %v1769_v48, %v1768_v43  ;;  %v1813_v10 = vmul.f32 %v1812_v52, %v1810_v37  ;;  %v1814_v12 = vmul.f32 %v1812_v52, %v1811_v6 }
 0x26e   : > { %v1770_v4 = vmul.f32 %v1769_v48, %v1767_v29  ;;  %v2572_v56 = vsel %vm4545_vm1, %v4469_v14, %v2568_v19  ;;  %v3666_v33 = vmov 1.0   ;;  %v4573_v6 = vsub.f32 %v2149_v61, %v4551_v9 }
 0x26f   : > { %3597 = vrcp.f32 %v4482_v47  ;;  %v1822_v2 = vsel %vm1728_vm2, %v1814_v12, 0  ;;  %v1819_v31 = vsel %vm1728_vm2, %v1813_v10, 0  ;;  %v1987_v51 = vsel %vm1728_vm2, %v1771_v50, 0 }
 0x270   : > { %v4491_v63 = vand.u32 4294901760, %v1822_v2  ;;  %v4493_v27 = vand.u32 4294901760, %v1819_v31  ;;  %v4512_v38 = vand.u32 4294901760, %v1987_v51  ;;  %v1984_v35 = vsel %vm1728_vm2, %v1770_v4, 0 }
 0x271   : > { %v2982_v16 = vand.u32 2147483648, %v4482_v47  ;;  %v4537_v40 = vand.u32 4294901760, %v1984_v35  ;;  %v2980_v3 = vand.u32 2147483647, %v4482_v47  ;;  %vm2976_vm5 = vweird.f32 %v4482_v47 }
 0x272   : > { %1839 = vmatpush.xpose.msrb.mxu2 %v4491_v63  ;;  %1975 = vmatpush.xpose.msrb.mxu1 %v4491_v63  ;;  %v4502_v18 = vsub.f32 %v1822_v2, %v4491_v63  ;;  %v4505_v25 = vsub.f32 %v1819_v31, %v4493_v27  ;;  %v4535_v49 = vsub.f32 %v1987_v51, %v4512_v38  ;;  %v2987_v10 = vperm.slane %v4473_v39, 3 }
 0x273   : > { %v2983_v60 = vor.u32 1.1754944e-38, %v2982_v16  ;;  %v4564_v45 = vsub.f32 %v1984_v35, %v4537_v40  ;;  %v2577_v52 = vsel %vm2574_vm4, %v2576_v62, %v2572_v56  ;;  %vm2981_vm7 = vcmp.eq.f32.partialorder %v2980_v3, 8.507059e+37 }
 0x274   : > { %v4510_v17 = vand.u32 4294901760, %v4502_v18  ;;  %v4515_v13 = vand.u32 4294901760, %v4505_v25  ;;  %v4567_v48 = vand.u32 4294901760, %v4535_v49  ;;  %v2152_v12 = vsel %vm1728_vm2, %v4050_v20, 0 }
 0x275   : > { %v3598_v55 = vpop.eup %3597  ;;  %v2579_v36 = vmul.f32 %v4414_v59, %v2577_v52  ;;  %v4586_v2 = vand.u32 4294901760, %v4564_v45  ;;  %v2580_v20 = vperm.slane %v4473_v39, 2  ;;  %v2174_v59 = vand.u32 4294901760, %v4573_v6 }
 0x276   : > { %v2972_v32 = vmul.f32 %v3598_v55, %v4482_v47  ;;  %1841 = vmatpush.xpose.msrb.mxu2 %v4493_v27  ;;  %1950 = vmatpush.xpose.msrb.mxu0 %v4510_v17  ;;  %v1868_v0 = vsub.f32 %v4502_v18, %v4510_v17  ;;  %v1874_v28 = vsub.f32 %v4505_v25, %v4515_v13  ;;  %vm2977_vm3 = vweird.f32 %v3598_v55 }
 0x277   : > { %1977 = vmatpush.xpose.msrb.mxu1 %v4493_v27  ;;  %vm2978_vm6 = vmor %vm2976_vm5, %vm2977_vm3  ;;  %v2033_v29 = vsub.f32 %v4535_v49, %v4567_v48  ;;  %v4598_v31 = vand.u32 4294901760, %v2152_v12  ;;  %v2578_v4 = vmul.f32 %v4411_v53, %v2577_v52  ;;  %v2039_v24 = vsub.f32 %v4564_v45, %v4586_v2 }
 0x278   : > { %v2973_v54 = vsub.f32 1.0, %v2972_v32  ;;  %v1869_v30 = vand.u32 4294901760, %v1868_v0  ;;  %v1875_v14 = vand.u32 4294901760, %v1874_v28  ;;  %v2582_v44 = vmul.f32 %v2580_v20, %v2579_v36 }
 0x279   : > { %1847 = vmatmul.f32.vlgmr.msrb.gmra.mxu2 %v4518_v8  ;;  %v2034_v51 = vand.u32 4294901760, %v2033_v29  ;;  %v2175_v53 = vsub.f32 %v4573_v6, %v2174_v59  ;;  %v4615_v39 = vsub.f32 %v2152_v12, %v4598_v31  ;;  %v2581_v32 = vmul.f32 %v2580_v20, %v2578_v4 }
 0x27a   : > { %1898 = vmatpush.xpose.msra.mxu2 %v4502_v18  ;;  %v2974_v23 = vmul.f32 %v3598_v55, %v2973_v54  ;;  %3496 = vmatmul.msk.f32.vlgmr.msrb.gmra.mxu1 %vm1728_vm2, %v3666_v33  ;;  %v2587_v61 = vsel %vm1728_vm2, %v2582_v44, 0  ;;  %v2753_v29 = vsel %vm1728_vm2, %v4029_v7, 0 }
 0x27b   : > { %2088 = vmatpush.xpose.msra.mxu1 %v4512_v38  ;;  %1870 = vmatpush.xpose.msrb.mxu3 %v1869_v30  ;;  %v4622_v35 = vand.u32 4294901760, %v2587_v61  ;;  %v2182_v19 = vand.u32 4294901760, %v4615_v39  ;;  %v2584_v0 = vsel %vm1728_vm2, %v2581_v32, 0 }
 0x27c   : > { %v2975_v15 = vadd.f32 %v3598_v55, %v2974_v23  ;;  %1954 = vmatpush.xpose.msrb.mxu0 %v4515_v13  ;;  %v4635_v1 = vand.u32 4294901760, %v2584_v0 }
 0x27d   : > { %v4633_v46 = vsub.f32 %v2587_v61, %v4622_v35  ;;  %v2183_v54 = vsub.f32 %v4615_v39, %v2182_v19 }
 0x27e   : > { %1901 = vmatpush.xpose.msra.mxu2 %v4505_v25  ;;  %v2979_v43 = vsel %vm2978_vm6, %v3598_v55, %v2975_v15  ;;  %v2040_v55 = vand.u32 4294901760, %v2039_v24 }
 0x27f   : > { %2090 = vmatpush.xpose.msra.mxu1 %v4537_v40  ;;  %v2984_v37 = vsel %vm2981_vm7, %v2983_v60, %v2979_v43  ;;  %3495 = vmatmul.msk.f32.vlgmr.msrb.gmra.mxu0 %vm1728_vm2, %v3666_v33  ;;  %v2184_v16 = vand.u32 4294901760, %v2183_v54 }
 0x280   : > { %2063 = vmatpush.xpose.msra.mxu0 %v4535_v49  ;;  %1876 = vmatpush.xpose.msrb.mxu3 %v1875_v14  ;;  %v2985_v47 = vmul.f32 %v4431_v57, %v2984_v37  ;;  %v2986_v50 = vmul.f32 %v4436_v11, %v2984_v37 }
 0x281   : > { %1904 = vmatmul.f32.vlgmr.msra.gmra.mxu2 %v4471_v42 }
 0x282   : > { %2004 = vmatpush.xpose.msrb.mxu2 %v4512_v38  ;;  %v4590_v57 = vmul.f32 %v2987_v10, %v2986_v50  ;;  %v4592_v11 = vmul.f32 %v2987_v10, %v2985_v47  ;;  %2094 = vmatmul.f32.vlgmr.msra.gmra.mxu1 %v4485_v21 }
 0x283   : > { %2208 = vmatpush.xpose.msrb.mxu1 %v1869_v30  ;;  %3494 = vmatmul.msk.f32.vlgmr.msrb.gmra.mxu3 %vm1728_vm2, %v3666_v33 }
 0x284   : > { %1923 = vmatpush.xpose.msra.mxu3 %v4491_v63  ;;  %2066 = vmatpush.xpose.msra.mxu0 %v4564_v45 }
 0x286   : > { %2006 = vmatpush.xpose.msrb.mxu2 %v4537_v40 }
 0x287   : > { %2214 = vmatpush.xpose.msrb.mxu1 %v1875_v14  ;;  %2069 = vmatmul.f32.vlgmr.msra.gmra.mxu0 %v4471_v42 }
 0x288   : > { %2169 = vmatpush.xpose.msrb.mxu0 %v4491_v63  ;;  %1925 = vmatpush.xpose.msra.mxu3 %v4493_v27 }
 0x289   : > { %2012 = vmatmul.f32.vlgmr.msrb.gmra.mxu2 %v4518_v8 }
 0x28a   : > { %2115 = vmatpush.xpose.msra.mxu2 %v4567_v48  ;;  %2216 = vmatmul.f32.vlgmr.msrb.gmra.mxu1 %v4551_v9 }
 0x28b   : > { %2332 = vmatpush.xpose.msra.mxu1 %v4491_v63  ;;  %1929 = vmatmul.f32.vlgmr.msra.gmra.mxu3 %v4485_v21 }
 0x28c   : > { %2171 = vmatpush.xpose.msrb.mxu0 %v4493_v27  ;;  %2035 = vmatpush.xpose.msrb.mxu3 %v2034_v51 }
 0x28e   : > { %2119 = vmatpush.xpose.msra.mxu2 %v4586_v2 }
 0x28f   : > { %2334 = vmatpush.xpose.msra.mxu1 %v4493_v27 }
 0x290   : > { %2303 = vmatpush.xpose.msra.mxu0 %v4510_v17  ;;  %2041 = vmatpush.xpose.msrb.mxu3 %v2040_v55  ;;  %v2176_v17 = vand.u32 4294901760, %v2175_v53 }
 0x291   : > { %3498 = vmatmul.msk.f32.vlgmr.msra.gmra.mxu2 %vm1728_vm2, %v3666_v33 }
 0x292   : > { %2240 = vmatpush.xpose.msrb.mxu2 %v4502_v18  ;;  %2177 = vmatmul.f32.vlgmr.msrb.gmra.mxu0 %v2176_v17  ;;  %v4646_v18 = vand.u32 4294901760, %v4633_v46 }
 0x293   : > { %2466 = vmatpush.xpose.msrb.mxu1 %v4512_v38  ;;  %3497 = vmatmul.msk.f32.vlgmr.msrb.gmra.mxu3 %vm1728_vm2, %v3666_v33 }
 0x294   : > { %2140 = vmatpush.xpose.msra.mxu3 %v4512_v38  ;;  %2307 = vmatpush.xpose.msra.mxu0 %v4515_v13  ;;  %v4649_v13 = vsub.f32 %v2584_v0, %v4635_v1  ;;  %v2633_v30 = vsub.f32 %v4633_v46, %v4646_v18 }
 0x295   : > { %2220 = vmatmul.f32.gmra.mxu1 %v4598_v31 }
 0x296   : > { %2243 = vmatpush.xpose.msrb.mxu2 %v4505_v25  ;;  %v2345_v25 = vsel %vm1728_vm2, %v4116_v58, 0 }
 0x297   : > { %2468 = vmatpush.xpose.msrb.mxu1 %v4537_v40  ;;  %v4663_v28 = vand.u32 4294901760, %v2345_v25 }
 0x298   : > { %2436 = vmatpush.xpose.msrb.mxu0 %v4535_v49  ;;  %2142 = vmatpush.xpose.msra.mxu3 %v4537_v40  ;;  %v4660_v49 = vand.u32 4294901760, %v4649_v13 }
 0x299   : > { %2246 = vmatmul.f32.vlgmr.msrb.gmra.mxu2 %v4573_v6  ;;  %v2369_v22 = vsub.f32 %v2345_v25, %v4663_v28  ;;  %v2750_v6 = vsel %vm1728_vm2, %v4035_v41, 0 }
 0x29a   : > { %2365 = vmatpush.xpose.msra.mxu2 %v4512_v38  ;;  %2185 = vmatmul.f32.gmra.mxu0 %v2184_v16  ;;  %v2639_v58 = vsub.f32 %v4649_v13, %v4660_v49  ;;  %v4738_v10 = vand.u32 4294901760, %v2750_v6 }
 0x29b   : > { %3499 = vmatmul.msk.f32.vlgmr.msra.gmra.mxu3 %vm1728_vm2, %v3666_v33  ;;  %v2370_v3 = vand.u32 4294901760, %v2369_v22 }
 0x29c   : > { %2270 = vmatpush.xpose.msrb.mxu3 %v4491_v63  ;;  %2439 = vmatpush.xpose.msrb.mxu0 %v4564_v45  ;;  %v4669_v63 = vand.u32 4294901760, %v2633_v30  ;;  %v4681_v23 = vand.u32 4294901760, %v2639_v58  ;;  %v2991_v45 = vsel %vm1728_vm2, %v4592_v11, 0  ;;  %v2774_v36 = vsub.f32 %v2750_v6, %v4738_v10 }
 0x29d   : > { %2336 = vmatmul.f32.vlgmr.msra.gmra.mxu1 %v4551_v9  ;;  %v4713_v52 = vand.u32 4294901760, %v2991_v45  ;;  %v4756_v11 = vand.u32 4294901760, %v2753_v29 }
 0x29e   : > { %2367 = vmatpush.xpose.msra.mxu2 %v4537_v40  ;;  %2635 = vmatpush.xpose.msra.mxu1 %v4669_v63 }
 0x29f   : > { %v4722_v37 = vsub.f32 %v2991_v45, %v4713_v52  ;;  %v2782_v20 = vsub.f32 %v2753_v29, %v4756_v11 }
 0x2a0   : > { %2272 = vmatpush.xpose.msrb.mxu3 %v4493_v27  ;;  %v2348_v27 = vsel %vm1728_vm2, %v4101_v34, 0  ;;  %v2371_v34 = vsub.f32 %v2369_v22, %v2370_v3 }
 0x2a1   : > { %v4683_v56 = vand.u32 4294901760, %v2348_v27  ;;  %2251 = vmatmul.f32.gmra.mxu2 %v4615_v39  ;;  %v4735_v50 = vand.u32 4294901760, %v4722_v37 }
 0x2a2   : > { %2499 = vmatpush.xpose.msrb.mxu2 %v4567_v48  ;;  %2309 = vmatmul.f32.vlgmr.msra.gmra.mxu0 %v4551_v9  ;;  %v2372_v62 = vand.u32 4294901760, %v2371_v34 }
 0x2a3   : > { %2604 = vmatpush.xpose.msra.mxu0 %v4622_v35  ;;  %2641 = vmatpush.xpose.msra.mxu1 %v4681_v23  ;;  %v2377_v9 = vsub.f32 %v2348_v27, %v4683_v56  ;;  %v3046_v12 = vsub.f32 %v4722_v37, %v4735_v50 }
 0x2a4   : > { %2404 = vmatpush.xpose.msra.mxu3 %v2034_v51  ;;  %v3157_v51 = vsel %vm1728_vm2, %v4025_v26, 0  ;;  %v3160_v26 = vsel %vm1728_vm2, %v4059_v5, 0 }
 0x2a5   : > { %2276 = vmatmul.f32.vlgmr.msrb.gmra.mxu3 %v2174_v59  ;;  %2340 = vmatmul.f32.gmra.mxu1 %v4598_v31  ;;  %v2378_v15 = vand.u32 4294901760, %v2377_v9  ;;  %v3180_v44 = vand.u32 4294901760, %v3157_v51 }
 0x2a6   : > { %2503 = vmatpush.xpose.msrb.mxu2 %v4586_v2  ;;  %v3047_v2 = vand.u32 4294901760, %v3046_v12 }
 0x2a7   : > { %2606 = vmatpush.xpose.msra.mxu0 %v4635_v1  ;;  %v2379_v60 = vsub.f32 %v2377_v9, %v2378_v15  ;;  %v3181_v53 = vsub.f32 %v3157_v51, %v3180_v44 }
 0x2a8   : > { %2410 = vmatpush.xpose.msra.mxu3 %v2040_v55  ;;  %v3188_v55 = vand.u32 4294901760, %v3160_v26 }
 0x2a9   : > { %2373 = vmatmul.f32.vlgmr.msra.gmra.mxu2 %v2372_v62  ;;  %v3182_v39 = vand.u32 4294901760, %v3181_v53 }
 0x2aa   : > { %2313 = vmatmul.f32.gmra.mxu0 %v4598_v31  ;;  %2663 = vmatpush.xpose.msra.mxu2 %v4633_v46  ;;  %v2783_v31 = vand.u32 4294901760, %v2782_v20 }
 0x2ab   : > { %v3183_v5 = vsub.f32 %v3181_v53, %v3182_v39 }
 0x2ac   : > { %2528 = vmatpush.xpose.msrb.mxu3 %v4512_v38  ;;  %v2994_v38 = vsel %vm1728_vm2, %v4590_v57, 0  ;;  %v2775_v57 = vand.u32 4294901760, %v2774_v36  ;;  %v2784_v4 = vsub.f32 %v2782_v20, %v2783_v31 }
 0x2ad   : > { %2282 = vmatmul.f32.gmra.mxu3 %v2182_v19  ;;  %2472 = vmatmul.f32.vlgmr.msrb.gmra.mxu1 %v2370_v3  ;;  %v4704_v14 = vand.u32 4294901760, %v2994_v38 }
 0x2ae   : > { %2740 = vmatpush.xpose.msrb.mxu1 %v4622_v35  ;;  %2666 = vmatpush.xpose.msra.mxu2 %v4649_v13  ;;  %v2776_v7 = vsub.f32 %v2774_v36, %v2775_v57  ;;  %v2785_v24 = vand.u32 4294901760, %v2784_v4 }
 0x2af   : > { %v4711_v48 = vsub.f32 %v2994_v38, %v4704_v14 }
 0x2b0   : > { %2530 = vmatpush.xpose.msrb.mxu3 %v4537_v40  ;;  %v2380_v40 = vand.u32 4294901760, %v2379_v60  ;;  %v2777_v59 = vand.u32 4294901760, %v2776_v7 }
 0x2b1   : > { %v4719_v43 = vand.u32 4294901760, %v4711_v48 }
 0x2b2   : > { %2442 = vmatmul.f32.vlgmr.msrb.gmra.mxu0 %v2369_v22  ;;  %2742 = vmatpush.xpose.msrb.mxu1 %v4635_v1 }
 0x2b3   : > { %2715 = vmatpush.xpose.msrb.mxu0 %v4646_v18  ;;  %2381 = vmatmul.f32.gmra.mxu2 %v2380_v40  ;;  %v3040_v47 = vsub.f32 %v4711_v48, %v4719_v43 }
 0x2b5   : > { %2412 = vmatmul.f32.vlgmr.msra.gmra.mxu3 %v4663_v28  ;;  %2478 = vmatmul.f32.gmra.mxu1 %v2378_v15  ;;  %v3041_v41 = vand.u32 4294901760, %v3040_v47 }
 0x2b6   : > { %2688 = vmatpush.xpose.msra.mxu3 %v4622_v35 }
 0x2b7   : > { %2719 = vmatpush.xpose.msrb.mxu0 %v4660_v49 }
 0x2ba   : > { %2447 = vmatmul.f32.gmra.mxu0 %v2377_v9  ;;  %2690 = vmatpush.xpose.msra.mxu3 %v4635_v1 }
 0x2bb   : > { %2505 = vmatmul.f32.vlgmr.msrb.gmra.mxu2 %v4663_v28 }
 0x2bc   : > { %2770 = vmatpush.xpose.msrb.mxu2 %v4622_v35 }
 0x2bd   : > { %2416 = vmatmul.f32.gmra.mxu3 %v4683_v56  ;;  %3500 = vmatmul.msk.f32.vlgmr.msra.gmra.mxu1 %vm1728_vm2, %v3666_v33 }
 0x2be   : > { %2871 = vmatpush.xpose.msra.mxu1 %v4622_v35 }
 0x2c0   : > { %2772 = vmatpush.xpose.msrb.mxu2 %v4635_v1 }
 0x2c2   : > { %2612 = vmatmul.f32.vlgmr.msra.gmra.mxu0 %v4518_v8  ;;  %2873 = vmatpush.xpose.msra.mxu1 %v4635_v1 }
 0x2c3   : > { %2841 = vmatpush.xpose.msra.mxu0 %v4633_v46  ;;  %2509 = vmatmul.f32.gmra.mxu2 %v4683_v56 }
 0x2c5   : > { %2532 = vmatmul.f32.vlgmr.msrb.gmra.mxu3 %v4663_v28  ;;  %3502 = vmatmul.msk.f32.vlgmr.msrb.gmra.mxu1 %vm1728_vm2, %v3666_v33 }
 0x2c6   : > { %2809 = vmatpush.xpose.msrb.mxu3 %v4669_v63  ;;  %3042 = vmatpush.xpose.msrb.mxu1 %v3041_v41 }
 0x2c7   : > { %2844 = vmatpush.xpose.msra.mxu0 %v4649_v13 }
 0x2ca   : > { %3501 = vmatmul.msk.f32.vlgmr.msrb.gmra.mxu0 %vm1728_vm2, %v3666_v33  ;;  %2815 = vmatpush.xpose.msrb.mxu3 %v4681_v23 }
 0x2cb   : > { %3011 = vmatpush.xpose.msrb.mxu0 %v4704_v14  ;;  %3048 = vmatpush.xpose.msrb.mxu1 %v3047_v2 }
 0x2cc   : > { %2669 = vmatmul.f32.vlgmr.msra.gmra.mxu2 %v4471_v42 }
 0x2cd   : > { %2536 = vmatmul.f32.gmra.mxu3 %v4683_v56  ;;  %2877 = vmatmul.f32.vlgmr.msra.gmra.mxu1 %v2775_v57 }
 0x2ce   : > { %2904 = vmatpush.xpose.msra.mxu2 %v4646_v18 }
 0x2cf   : > { %3013 = vmatpush.xpose.msrb.mxu0 %v4713_v52  ;;  %3095 = vmatpush.xpose.msra.mxu1 %v4704_v14 }
 0x2d2   : > { %2847 = vmatmul.f32.vlgmr.msra.gmra.mxu0 %v2774_v36  ;;  %2908 = vmatpush.xpose.msra.mxu2 %v4660_v49 }
 0x2d3   : > { %3070 = vmatpush.xpose.msra.mxu0 %v4711_v48  ;;  %3097 = vmatpush.xpose.msra.mxu1 %v4713_v52 }
 0x2d4   : > { %2778 = vmatmul.f32.vlgmr.msrb.gmra.mxu2 %v2777_v59 }
 0x2d5   : > { %2694 = vmatmul.f32.vlgmr.msra.gmra.mxu3 %v4485_v21  ;;  %2883 = vmatmul.f32.gmra.mxu1 %v2783_v31 }
 0x2d6   : > { %2933 = vmatpush.xpose.msra.mxu3 %v4622_v35  ;;  %3122 = vmatpush.xpose.msrb.mxu2 %v4719_v43 }
 0x2d7   : > { %3073 = vmatpush.xpose.msra.mxu0 %v4722_v37 }
 0x2da   : > { %2852 = vmatmul.f32.gmra.mxu0 %v2782_v20  ;;  %2935 = vmatpush.xpose.msra.mxu3 %v4635_v1 }
 0x2db   : > { %3126 = vmatpush.xpose.msrb.mxu2 %v4735_v50 }
 0x2dc   : > { %2786 = vmatmul.f32.gmra.mxu2 %v2785_v24 }
 0x2dd   : > { %2817 = vmatmul.f32.vlgmr.msrb.gmra.mxu3 %v4738_v10  ;;  %3503 = vmatmul.msk.f32.vlgmr.msrb.gmra.mxu1 %vm1728_vm2, %v3666_v33 }
 0x2de   : > { %3147 = vmatpush.xpose.msrb.mxu3 %v4704_v14  ;;  %3216 = vmatpush.xpose.msrb.mxu1 %v3041_v41 }
 0x2e2   : > { %3019 = vmatmul.f32.vlgmr.msrb.gmra.mxu0 %v4518_v8  ;;  %3149 = vmatpush.xpose.msrb.mxu3 %v4713_v52  ;;  %v3189_v8 = vsub.f32 %v3160_v26, %v3188_v55 }
 0x2e3   : > { %3177 = vmatpush.xpose.msrb.mxu0 %v4704_v14  ;;  %3222 = vmatpush.xpose.msrb.mxu1 %v3047_v2 }
 0x2e4   : > { %2910 = vmatmul.f32.vlgmr.msra.gmra.mxu2 %v4738_v10  ;;  %v3190_v61 = vand.u32 4294901760, %v3189_v8 }
 0x2e5   : > { %2821 = vmatmul.f32.gmra.mxu3 %v4756_v11  ;;  %3101 = vmatmul.f32.vlgmr.msra.gmra.mxu1 %v4485_v21  ;;  %v3184_v21 = vand.u32 4294901760, %v3183_v5 }
 0x2e6   : > { %3248 = vmatpush.xpose.msra.mxu2 %v4711_v48 }
 0x2e7   : > { %3179 = vmatpush.xpose.msrb.mxu0 %v4713_v52  ;;  %3340 = vmatpush.xpose.msra.mxu1 %v4704_v14 }
 0x2ea   : > { %3076 = vmatmul.f32.vlgmr.msra.gmra.mxu0 %v4471_v42  ;;  %3251 = vmatpush.xpose.msra.mxu2 %v4722_v37  ;;  %v3191_v42 = vsub.f32 %v3189_v8, %v3190_v61 }
 0x2eb   : > { %3311 = vmatpush.xpose.msra.mxu0 %v4719_v43  ;;  %3342 = vmatpush.xpose.msra.mxu1 %v4713_v52 }
 0x2ec   : > { %2914 = vmatmul.f32.gmra.mxu2 %v4756_v11  ;;  %v3192_v32 = vand.u32 4294901760, %v3191_v42 }
 0x2ed   : > { %2937 = vmatmul.f32.vlgmr.msra.gmra.mxu3 %v4738_v10  ;;  %3224 = vmatmul.f32.vlgmr.msrb.gmra.mxu1 %v3180_v44 }
 0x2ee   : > { %3278 = vmatpush.xpose.msra.mxu3 %v4704_v14 }
 0x2ef   : > { %3315 = vmatpush.xpose.msra.mxu0 %v4735_v50 }
 0x2f2   : > { %3185 = vmatmul.f32.vlgmr.msrb.gmra.mxu0 %v3184_v21  ;;  %3280 = vmatpush.xpose.msra.mxu3 %v4713_v52 }
 0x2f4   : > { %3504 = vmatmul.msk.f32.vlgmr.msrb.gmra.mxu2 %vm1728_vm2, %v3666_v33 }
 0x2f5   : > { %2941 = vmatmul.f32.gmra.mxu3 %v4756_v11  ;;  %3228 = vmatmul.f32.gmra.mxu1 %v3188_v55 }
 0x2f7   : > { %v1980_v35 = vpop.f32.mrf.mxu1 }
 0x2fa   : > { %3193 = vmatmul.f32.gmra.mxu0 %v3192_v32 }
 0x2fc   : > { %3254 = vmatmul.f32.vlgmr.msra.gmra.mxu2 %v3181_v53  ;;  %v1957_v17 = vpop.f32.mrf.mxu0  ;;  %v1848_v19 = vpop.f32.mrf.mxu2 }
 0x2fd   : > { %3505 = vmatmul.msk.f32.vlgmr.msrb.gmra.mxu3 %vm1728_vm2, %v3666_v33  ;;  %3344 = vmatmul.f32.vlgmr.msra.gmra.mxu1 %v3180_v44 }
 0x2ff   : > { %v2095_v0 = vpop.f32.mrf.mxu1 }
 0x302   : > { %3317 = vmatmul.f32.vlgmr.msra.gmra.mxu0 %v3180_v44 }
 0x304   : > { %3259 = vmatmul.f32.gmra.mxu2 %v3189_v8  ;;  %v2070_v46 = vpop.f32.mrf.mxu0  ;;  %v1905_v18 = vpop.f32.mrf.mxu2 }
 0x305   : > { %3284 = vmatmul.f32.vlgmr.msra.gmra.mxu3 %v3182_v39  ;;  %3348 = vmatmul.f32.gmra.mxu1 %v3188_v55 }
 0x306   : > { %v1879_v1 = vpop.f32.mrf.mxu3 }
 0x307   : > { %v1880_v54 = vadd.f32 %v1879_v1, %v1848_v19  ;;  %v2217_v16 = vpop.f32.mrf.mxu1 }
 0x309   : > { %v1906_v13 = vadd.f32 %v1905_v18, %v1880_v54 }
 0x30a   : > { %3321 = vmatmul.f32.gmra.mxu0 %v3188_v55 }
 0x30c   : > { %v2013_v49 = vpop.f32.mrf.mxu2 }
 0x30d   : > { %3290 = vmatmul.f32.gmra.mxu3 %v3190_v61 }
 0x30e   : > { %v1930_v33 = vpop.f32.mrf.mxu3 }
 0x30f   : > { %v2178_v25 = vpop.f32.mrf.mxu0  ;;  %v1931_v28 = vadd.f32 %v1930_v33, %v1906_v13 }
 0x310   : > { %v2218_v30 = vadd.f32 %v2217_v16, %v2178_v25 }
 0x311   : > { %v1958_v63 = vadd.f32 %v1957_v17, %v1931_v28 }
 0x312   : > { %v2221_v58 = vpop.f32.mrf.mxu1 }
 0x313   : > { %v1981_v22 = vadd.f32 %v1980_v35, %v1958_v63 }
 0x314   : > { %v2122_v34 = vpop.f32.mrf.mxu2 }
 0x315   : > { %v2014_v3 = vadd.f32 %v2013_v49, %v1981_v22 }
 0x316   : > { %v2044_v56 = vpop.f32.mrf.mxu3 }
 0x317   : > { %v2186_v27 = vpop.f32.mrf.mxu0  ;;  %v2045_v9 = vadd.f32 %v2044_v56, %v2014_v3 }
 0x318   : > { %v2222_v23 = vadd.f32 %v2221_v58, %v2186_v27 }
 0x319   : > { %v2071_v62 = vadd.f32 %v2070_v46, %v2045_v9 }
 0x31a   : > { %v2337_v15 = vpop.f32.mrf.mxu1 }
 0x31b   : > { %v2096_v60 = vadd.f32 %v2095_v0, %v2071_v62 }
 0x31c   : > { %v2247_v45 = vpop.f32.mrf.mxu2 }
 0x31d   : > { %v2123_v40 = vadd.f32 %v2122_v34, %v2096_v60  ;;  %v2248_v52 = vadd.f32 %v2247_v45, %v2218_v30 }
 0x31e   : > { %v2145_v14 = vpop.f32.mrf.mxu3 }
 0x31f   : > { %v2310_v38 = vpop.f32.mrf.mxu0  ;;  %v4804_v48 = vadd.f32 %v2145_v14, %v2123_v40 }
 0x322   : > { %v2341_v43 = vpop.f32.mrf.mxu1 }
 0x324   : > { %v2252_v6 = vpop.f32.mrf.mxu2 }
 0x325   : > { %v2253_v50 = vadd.f32 %v2252_v6, %v2222_v23 }
 0x327   : > { %v2314_v37 = vpop.f32.mrf.mxu0 }
 0x328   : > { %v2277_v47 = vpop.f32.mrf.mxu3 }
 0x329   : > { %v2278_v10 = vadd.f32 %v2277_v47, %v2248_v52 }
 0x32a   : > { %v2473_v12 = vpop.f32.mrf.mxu1 }
 0x32b   : > { %v2311_v41 = vadd.f32 %v2310_v38, %v2278_v10 }
 0x32c   : > { %v2374_v57 = vpop.f32.mrf.mxu2 }
 0x32d   : > { %v2338_v29 = vadd.f32 %v2337_v15, %v2311_v41 }
 0x32f   : > { %v2443_v36 = vpop.f32.mrf.mxu0  ;;  %v2375_v7 = vadd.f32 %v2374_v57, %v2338_v29 }
 0x330   : > { %v2283_v2 = vpop.f32.mrf.mxu3 }
 0x331   : > { %v2284_v11 = vadd.f32 %v2283_v2, %v2253_v50 }
 0x332   : > { %v2479_v59 = vpop.f32.mrf.mxu1 }
 0x333   : > { %v2315_v20 = vadd.f32 %v2314_v37, %v2284_v11 }
 0x335   : > { %v2342_v4 = vadd.f32 %v2341_v43, %v2315_v20 }
 0x336   : > { %v2382_v51 = vpop.f32.mrf.mxu2 }
 0x337   : > { %v2448_v31 = vpop.f32.mrf.mxu0  ;;  %v2383_v44 = vadd.f32 %v2382_v51, %v2342_v4 }
 0x338   : > { %v2413_v24 = vpop.f32.mrf.mxu3 }
 0x339   : > { %v2414_v53 = vadd.f32 %v2413_v24, %v2375_v7 }
 0x33a   : > { %v2644_v39 = vpop.f32.mrf.mxu1 }
 0x33b   : > { %v2444_v26 = vadd.f32 %v2443_v36, %v2414_v53 }
 0x33d   : > { %v2474_v5 = vadd.f32 %v2473_v12, %v2444_v26 }
 0x33e   : > { %v2506_v21 = vpop.f32.mrf.mxu2 }
 0x33f   : > { %v2613_v55 = vpop.f32.mrf.mxu0  ;;  %v2507_v42 = vadd.f32 %v2506_v21, %v2474_v5 }
 0x340   : > { %v2417_v8 = vpop.f32.mrf.mxu3  ;;  %v2645_v38 = vadd.f32 %v2644_v39, %v2613_v55 }
 0x341   : > { %v2418_v61 = vadd.f32 %v2417_v8, %v2383_v44 }
 0x342   : > { %v2745_v35 = vpop.f32.mrf.mxu1 }
 0x343   : > { %v2449_v32 = vadd.f32 %v2448_v31, %v2418_v61 }
 0x345   : > { %v2480_v19 = vadd.f32 %v2479_v59, %v2449_v32 }
 0x346   : > { %v2510_v0 = vpop.f32.mrf.mxu2 }
 0x347   : > { %v2722_v17 = vpop.f32.mrf.mxu0  ;;  %v2511_v1 = vadd.f32 %v2510_v0, %v2480_v19 }
 0x348   : > { %v2533_v46 = vpop.f32.mrf.mxu3 }
 0x349   : > { %v2534_v54 = vadd.f32 %v2533_v46, %v2507_v42  ;;  %v3354_v42 = vld [vmem:[%s4865_s9] sm:$0xff] }
 0x34a   : > { %v2878_v18 = vpop.f32.mrf.mxu1 }
 0x34f   : > { %v2848_v13 = vpop.f32.mrf.mxu0  ;;  %v2670_v25 = vpop.f32.mrf.mxu2 }
 0x350   : > { %v2537_v16 = vpop.f32.mrf.mxu3  ;;  %v2671_v14 = vadd.f32 %v2670_v25, %v2645_v38 }
 0x351   : > { %v4806_v30 = vadd.f32 %v2537_v16, %v2511_v1 }
 0x352   : > { %v2884_v49 = vpop.f32.mrf.mxu1 }
 0x357   : > { %v2853_v33 = vpop.f32.mrf.mxu0  ;;  %v2779_v63 = vpop.f32.mrf.mxu2 }
 0x358   : > { %v2695_v28 = vpop.f32.mrf.mxu3 }
 0x359   : > { %v2696_v37 = vadd.f32 %v2695_v28, %v2671_v14 }
 0x35a   : > { %v3051_v23 = vpop.f32.mrf.mxu1 }
 0x35b   : > { %v2723_v47 = vadd.f32 %v2722_v17, %v2696_v37 }
 0x35d   : > { %v2746_v29 = vadd.f32 %v2745_v35, %v2723_v47 }
 0x35f   : > { %v3020_v58 = vpop.f32.mrf.mxu0  ;;  %v2787_v22 = vpop.f32.mrf.mxu2  ;;  %v2748_v4 = vadd.f32 %v2746_v29, %v4804_v48 }
 0x360   : > { %v2818_v27 = vpop.f32.mrf.mxu3  ;;  %v3052_v45 = vadd.f32 %v3051_v23, %v3020_v58  ;;  %v3355_v58 = vld [vmem:[%s4865_s9 + $0x8] sm:$0xff] }
 0x361   : > { %v2819_v50 = vadd.f32 %v2818_v27, %v2779_v63 }
 0x362   : > { %v3102_v9 = vpop.f32.mrf.mxu1 }
 0x363   : > { %v2849_v2 = vadd.f32 %v2848_v13, %v2819_v50 }
 0x365   : > { %v2879_v59 = vadd.f32 %v2878_v18, %v2849_v2 }
 0x367   : > { %v2911_v56 = vpop.f32.mrf.mxu2  ;;  %v3077_v34 = vpop.f32.mrf.mxu0 }
 0x368   : > { %v2822_v3 = vpop.f32.mrf.mxu3  ;;  %v3078_v6 = vadd.f32 %v3077_v34, %v3052_v45  ;;  %v2912_v51 = vadd.f32 %v2911_v56, %v2879_v59  ;;  %v3403_v59 = vpop.permute.xlu0 %3402 }
 0x369   : > { %v2823_v20 = vadd.f32 %v2822_v3, %v2787_v22 }
 0x36a   : > { %v3225_v40 = vpop.f32.mrf.mxu1  ;;  %v3103_v41 = vadd.f32 %v3102_v9, %v3078_v6 }
 0x36b   : > { %v2854_v39 = vadd.f32 %v2853_v33, %v2823_v20 }
 0x36d   : > { %v2885_v35 = vadd.f32 %v2884_v49, %v2854_v39 }
 0x36f   : > { %v2915_v62 = vpop.f32.mrf.mxu2  ;;  %v3186_v60 = vpop.f32.mrf.mxu0 }
 0x370   : > { %v2938_v15 = vpop.f32.mrf.mxu3  ;;  %v3226_v31 = vadd.f32 %v3225_v40, %v3186_v60  ;;  %v2916_v0 = vadd.f32 %v2915_v62, %v2885_v35 }
 0x371   : > { %v2939_v55 = vadd.f32 %v2938_v15, %v2912_v51 }
 0x372   : > { %v3229_v12 = vpop.f32.mrf.mxu1 }
 0x373   : > { %v2945_v17 = vadd.f32 %v2939_v55, %v2534_v54 }
 0x377   : > { %v3129_v43 = vpop.f32.mrf.mxu2  ;;  %v3194_v10 = vpop.f32.mrf.mxu0 }
 0x378   : > { %v2942_v52 = vpop.f32.mrf.mxu3  ;;  %v3130_v57 = vadd.f32 %v3129_v43, %v3103_v41  ;;  %v3230_v19 = vadd.f32 %v3229_v12, %v3194_v10 }
 0x379   : > { %v2943_v16 = vadd.f32 %v2942_v52, %v2916_v0 }
 0x37a   : > { %v3345_v8 = vpop.f32.mrf.mxu1 }
 0x37b   : > { %v2946_v49 = vadd.f32 %v2943_v16, %v4806_v30 }
 0x37f   : > { %v3255_v11 = vpop.f32.mrf.mxu2  ;;  %v3318_v53 = vpop.f32.mrf.mxu0 }
 0x380   : > { %v3152_v36 = vpop.f32.mrf.mxu3  ;;  %v3256_v44 = vadd.f32 %v3255_v11, %v3226_v31  ;;  %v3394_v11 = vpop.permute.xlu2 %3393 }
 0x381   : > { %v3153_v7 = vadd.f32 %v3152_v36, %v3130_v57 }
 0x382   : > { %v3349_v22 = vpop.f32.mrf.mxu1 }
 0x383   : > { %v3155_v24 = vadd.f32 %v3153_v7, %v2748_v4 }
 0x385   : > { %v3356_v21 = vperm.slane %v3155_v24, 0 }
 0x387   : > { %v3260_v32 = vpop.f32.mrf.mxu2  ;;  %v3357_v46 = vmul.f32 %v3356_v21, %v3354_v42  ;;  %v3322_v28 = vpop.f32.mrf.mxu0  ;;  %v3358_v27 = vmul.f32 %v3356_v21, %v3355_v58 }
 0x388   : > { %v3285_v26 = vpop.f32.mrf.mxu3  ;;  %v3261_v1 = vadd.f32 %v3260_v32, %v3230_v19 }
 0x389   : > { %v3286_v5 = vadd.f32 %v3285_v26, %v3256_v44 }
 0x38b   : > { %v3319_v61 = vadd.f32 %v3318_v53, %v3286_v5 }
 0x38d   : > { %v3346_v48 = vadd.f32 %v3345_v8, %v3319_v61 }
 0x38f   : > { %v3352_v18 = vadd.f32 %v3346_v48, %v2945_v17 }
 0x390   : > { %v3291_v13 = vpop.f32.mrf.mxu3 }
 0x391   : > { %v3359_v25 = vsub.f32 %v3352_v18, %v3357_v46  ;;  %v3292_v33 = vadd.f32 %v3291_v13, %v3261_v1 }
 0x393   : > { %v3323_v63 = vadd.f32 %v3322_v28, %v3292_v33  ;;  %v3361_v3 = vand.u32 2147483647, %v3359_v25 }
 0x395   : > { %v3350_v54 = vadd.f32 %v3349_v22, %v3323_v63  ;;  %v3363_v9 = vsel %vm1728_vm2, %v3361_v3, 0.0 }
 0x397   : > { %v3353_v23 = vadd.f32 %v3350_v54, %v2946_v49 }
 0x399   : > { %v3360_v56 = vsub.f32 %v3353_v23, %v3358_v27 }
 0x39b   : > { %v3362_v34 = vand.u32 2147483647, %v3360_v56 }
 0x39d   : > { %v3364_v62 = vsel %vm1728_vm2, %v3362_v34, 0.0 }
 0x39e   : > { %v3365_v15 = vadd.f32 %v3364_v62, %v3363_v9 }
 0x3a0   : > { %v3366_v60 = vrot.slane %v3365_v15, 4 }
 0x3a2   : > { %v3367_v38 = vadd.f32 %v3366_v60, %v3365_v15 }
 0x3a4   : > { %v3368_v40 = vrot.slane %v3367_v38, 2 }
 0x3a6   : > { %v3369_v14 = vadd.f32 %v3368_v40, %v3367_v38 }
 0x3a8   : > { %v3370_v45 = vrot.slane %v3369_v14, 1 }
 0x3aa   : > { %v3371_v30 = vadd.f32 %v3370_v45, %v3369_v14 }
 0x3ac   : > { %v3372_v52 = vmax.f32 %v3371_v30, 1e-12 }
 0x3ae   : > { %3599 = vrcp.f32 %v3372_v52  ;;  %v3384_v47 = vand.u32 2147483648, %v3372_v52  ;;  %v3382_v10 = vand.u32 2147483647, %v3372_v52  ;;  %vm3378_vm9 = vweird.f32 %v3372_v52 }
 0x3b0   : > { %v3385_v12 = vor.u32 1.1754944e-38, %v3384_v47  ;;  %vm3383_vm11 = vcmp.eq.f32.partialorder %v3382_v10, 8.507059e+37 }
 0x3b4   : > { %v3600_v43 = vpop.eup %3599 }
 0x3b5   : > { %v3374_v37 = vmul.f32 %v3600_v43, %v3372_v52  ;;  %vm3379_vm8 = vweird.f32 %v3600_v43 }
 0x3b6   : > { %vm3380_vm10 = vmor %vm3378_vm9, %vm3379_vm8 }
 0x3b7   : > { %v3375_v6 = vsub.f32 1.0, %v3374_v37 }
 0x3b9   : > { %v3376_v50 = vmul.f32 %v3600_v43, %v3375_v6 }
 0x3bb   : > { %v3377_v41 = vadd.f32 %v3600_v43, %v3376_v50 }
 0x3bd   : > { %v3381_v36 = vsel %vm3380_vm10, %v3600_v43, %v3377_v41 }
 0x3be   : > { %v3386_v29 = vsel %vm3383_vm11, %v3385_v12, %v3381_v36 }
 0x3bf   : > { %v3387_v2 = vmul.f32 %v3386_v29, %v3359_v25  ;;  %v3388_v57 = vmul.f32 %v3386_v29, %v3360_v56 }
 0x3c1   : > { %v3396_v7 = vmul.f32 %v3394_v11, %v3387_v2  ;;  %v3397_v20 = vmul.f32 %v3394_v11, %v3388_v57 }
 0x3c3   : > { %v3406_v31 = vadd.f32 %v3403_v59, %v3397_v20  ;;  %v3405_v4 = vadd.f32 %v3403_v59, %v3396_v7 }
 0x3c5   : > { %3407 = vst.msk [vmem:[%s410_s13] sm:$0xff] %vm1728_vm2, %v3405_v4 }
 0x3c6   : > { %3408 = vst.msk [vmem:[%s410_s13 + $0x8] sm:$0xff] %vm1728_vm2, %v3406_v31 }
 0x3c7   : > { %3628 = shalt.err (!%p3625_p3)
}
 0x3c8   : > { %s3667_s21 = smov 128   ;;  %s3668_s13 = smov 8  }
 0x3c9   : > { %3521 = dma.vmem_to_hbm [thread:$0]  (%p3778_p5), %s3423_s17, 256, %s3425_s18, %s3410_s10, %s3667_s21, %s3667_s21, %s3668_s13  }
 0x3ca PF: > { %p3527_p4 = scmp.ge.s32.totalorder %s3663_s28, 2  ;;  %s3439_s22 = sand.u32 1, %s3651_s25  }
 0x3cb   : > { %s3440_s23 = scalar_lea.sflag [#allocation5], %s3439_s22 }
 0x3cc   : > { %p3524_p7 = pnand %p3527_p4, %p3782_p6 }
 0x3ce   : > { %p3525_p8 = pneg %p3524_p7 }
 0x3d0   : > { %3646 = dma.done.wait (%p3525_p8), %s3440_s23, 256  }
 0x3d1   : > { %3648 = vsyncadd (%p3525_p8), %s3440_s23, 4294967040  ;;  %p26_p9 = scmp.ge.s32.totalorder %s3765_s29, 4   ;;  %s4881_s25 = smov %s3655_s26 }
 0x3d2   : > { %s4882_s26 = smov %s3659_s27  ;;  %s4883_s27 = smov %s3776_s14 }
 0x3d3   : > { %s4884_s28 = smov %s3765_s29  ;;  %28 = sbr.rel (!%p26_p9) target bundleno = 7 (0x7), region = 103 }
 0x3d8   :  { %3446 = vsyncpa [#allocation5], 1 }
 0x3d9   :  { %3448 = vsyncpa [#allocation5 + $0x1], 1 }

</bundles_post_ra>
